<compile_context>
chip_gen: v7x
topology: tpu7x:2x2x1
jax: 0.10.0
libtpu: 0.0.40
codegen_flags: <defaults>
</compile_context>

<pallas_src>
import functools
import math

import jax
import jax.numpy as jnp
from jax.experimental import pallas as pl
from jax.experimental.pallas import tpu as pltpu


_LANE_TILES = (512, 256, 128)                  # last-dim tiles: 128-multiples
_SUB_TILES = (512, 256, 128, 64, 32, 16, 8)    # 2nd-minor tiles: 8-multiples
_VMEM_LIMIT = 48 * 1024 * 1024                 # explicit budget (fits v7x 64MiB)


def _pick_tile(dim, candidates):
    """Largest candidate tile that evenly divides `dim`, else the full dim."""
    for c in candidates:
        if dim >= c and dim % c == 0:
            return c
    return dim


def _cparams(dims):
    return pltpu.CompilerParams(dimension_semantics=dims,
                                vmem_limit_bytes=_VMEM_LIMIT)


# ----------------------------------------------------------------------------
# Tiled matmul: y = relu?(x @ w + b), bf16 MXU inputs, f32 accumulation
# ----------------------------------------------------------------------------
def _matmul_kernel(x_ref, w_ref, b_ref, o_ref, acc_ref, *, relu):
    @pl.when(pl.program_id(2) == 0)
    def _():
        acc_ref[...] = jnp.zeros_like(acc_ref)

    acc_ref[...] += jnp.dot(x_ref[...], w_ref[...],
                            preferred_element_type=jnp.float32)

    @pl.when(pl.program_id(2) == pl.num_programs(2) - 1)
    def _():
        y = acc_ref[...] + b_ref[...]
        if relu:
            y = jnp.maximum(y, 0.0)
        o_ref[...] = y.astype(o_ref.dtype)


def matmul(x, w, b=None, *, relu=False, out_dtype=jnp.float32):
    """x:(M,K), w:(K,N) -> (M,N). Grid (M/tm, N/tn, K/tk), K innermost."""
    M, K = x.shape
    N = w.shape[1]
    tm = _pick_tile(M, _SUB_TILES)
    tn = _pick_tile(N, _LANE_TILES)
    tk = _pick_tile(K, _LANE_TILES)
    b2 = (jnp.zeros((1, N), jnp.float32) if b is None
          else b.reshape(1, N).astype(jnp.float32))
    return pl.pallas_call(
        functools.partial(_matmul_kernel, relu=relu),
        out_shape=jax.ShapeDtypeStruct((M, N), out_dtype),
        grid=(M // tm, N // tn, K // tk),
        in_specs=[
            pl.BlockSpec((tm, tk), lambda i, j, k: (i, k)),
            pl.BlockSpec((tk, tn), lambda i, j, k: (k, j)),   # no M dependence
            pl.BlockSpec((1, tn), lambda i, j, k: (0, j)),
        ],
        out_specs=pl.BlockSpec((tm, tn), lambda i, j, k: (i, j)),
        scratch_shapes=[pltpu.VMEM((tm, tn), jnp.float32)],
        compiler_params=_cparams(("parallel", "parallel", "arbitrary")),
    )(x.astype(jnp.bfloat16), w.astype(jnp.bfloat16), b2)


# ----------------------------------------------------------------------------
# Flash-style multi-head attention (online softmax over Sk tiles)
# ----------------------------------------------------------------------------
def _flash_attn_kernel(q_ref, k_ref, v_ref, o_ref, m_sc, l_sc, acc_sc,
                       *, scale, causal, tsq, tsk):
    ki = pl.program_id(2)

    @pl.when(ki == 0)
    def _():
        m_sc[...] = jnp.full_like(m_sc, -jnp.inf)
        l_sc[...] = jnp.zeros_like(l_sc)
        acc_sc[...] = jnp.zeros_like(acc_sc)

    q = q_ref[0]        # (tsq, D) bf16
    k = k_ref[0]        # (tsk, D) bf16
    v = v_ref[0]        # (tsk, D) bf16
    s = jax.lax.dot_general(q, k, (((1,), (1,)), ((), ())),
                            preferred_element_type=jnp.float32) * scale
    if causal:
        # causal (tag) mask generated in-kernel -> no mask DMA, no float ==
        qpos = pl.program_id(1) * tsq + jax.lax.broadcasted_iota(
            jnp.int32, s.shape, 0)
        kpos = ki * tsk + jax.lax.broadcasted_iota(jnp.int32, s.shape, 1)
        s = jnp.where(qpos >= kpos, s, jnp.float32(-1e20))

    m_prev = m_sc[...]
    m_new = jnp.maximum(m_prev, jnp.max(s, axis=-1, keepdims=True))
    alpha = jnp.exp(m_prev - m_new)
    p = jnp.exp(s - m_new)
    l_sc[...] = alpha * l_sc[...] + jnp.sum(p, axis=-1, keepdims=True)
    acc_sc[...] = alpha * acc_sc[...] + jnp.dot(
        p.astype(jnp.bfloat16), v, preferred_element_type=jnp.float32)
    m_sc[...] = m_new

    @pl.when(ki == pl.num_programs(2) - 1)
    def _():
        o_ref[0] = (acc_sc[...] *
                    pl.reciprocal(l_sc[...], approx=True)).astype(o_ref.dtype)


def flash_attention(q, k, v, *, scale, causal):
    """q:(BH,Sq,D), k/v:(BH,Sk,D) -> (BH,Sq,D) bf16."""
    BH, Sq, D = q.shape
    Sk = k.shape[1]
    tsq = _pick_tile(Sq, _SUB_TILES)
    tsk = _pick_tile(Sk, _SUB_TILES)
    return pl.pallas_call(
        functools.partial(_flash_attn_kernel, scale=scale, causal=causal,
                          tsq=tsq, tsk=tsk),
        out_shape=jax.ShapeDtypeStruct((BH, Sq, D), jnp.bfloat16),
        grid=(BH, Sq // tsq, Sk // tsk),
        in_specs=[
            pl.BlockSpec((1, tsq, D), lambda b, qi, ki: (b, qi, 0)),
            pl.BlockSpec((1, tsk, D), lambda b, qi, ki: (b, 0, ki)),
            pl.BlockSpec((1, tsk, D), lambda b, qi, ki: (b, 0, ki)),
        ],
        out_specs=pl.BlockSpec((1, tsq, D), lambda b, qi, ki: (b, qi, 0)),
        scratch_shapes=[
            pltpu.VMEM((tsq, 1), jnp.float32),   # running max  m
            pltpu.VMEM((tsq, 1), jnp.float32),   # running sum  l
            pltpu.VMEM((tsq, D), jnp.float32),   # running acc
        ],
        compiler_params=_cparams(("parallel", "parallel", "arbitrary")),
    )(q.astype(jnp.bfloat16), k.astype(jnp.bfloat16), v.astype(jnp.bfloat16))


# ----------------------------------------------------------------------------
# Fused epilogues
# ----------------------------------------------------------------------------
def _linear_add_ln_kernel(x_ref, w_ref, b_ref, r_ref, g_ref, bb_ref, o_ref):
    y = jnp.dot(x_ref[...], w_ref[...], preferred_element_type=jnp.float32)
    y = y + b_ref[...] + r_ref[...]
    mu = jnp.mean(y, axis=-1, keepdims=True)
    var = jnp.mean((y - mu) * (y - mu), axis=-1, keepdims=True)
    o_ref[...] = (y - mu) * jax.lax.rsqrt(var + 1e-5) * g_ref[...] + bb_ref[...]


def linear_add_layernorm(x, w, b, res, gamma, beta):
    """LayerNorm(x @ w + b + res) over the last axis (eps=1e-5). x:(M,K)."""
    M, K = x.shape
    N = w.shape[1]
    tm = _pick_tile(M, _SUB_TILES)
    return pl.pallas_call(
        _linear_add_ln_kernel,
        out_shape=jax.ShapeDtypeStruct((M, N), jnp.float32),
        grid=(M // tm,),
        in_specs=[
            pl.BlockSpec((tm, K), lambda i: (i, 0)),
            pl.BlockSpec((K, N), lambda i: (0, 0)),    # weight resident in VMEM
            pl.BlockSpec((1, N), lambda i: (0, 0)),
            pl.BlockSpec((tm, N), lambda i: (i, 0)),
            pl.BlockSpec((1, N), lambda i: (0, 0)),
            pl.BlockSpec((1, N), lambda i: (0, 0)),
        ],
        out_specs=pl.BlockSpec((tm, N), lambda i: (i, 0)),
        compiler_params=_cparams(("parallel",)),
    )(x.astype(jnp.bfloat16), w.astype(jnp.bfloat16),
      b.reshape(1, N).astype(jnp.float32), res.astype(jnp.float32),
      gamma.reshape(1, N).astype(jnp.float32),
      beta.reshape(1, N).astype(jnp.float32))


def _ffn_add_ln_kernel(x_ref, w1_ref, b1_ref, w2_ref, b2_ref, g_ref, bb_ref,
                       o_ref):
    x = x_ref[...]                                             # (tm, E) f32
    h = jnp.dot(x.astype(jnp.bfloat16), w1_ref[...],
                preferred_element_type=jnp.float32) + b1_ref[...]
    h = jnp.maximum(h, 0.0)                                    # ReLU in f32
    y = jnp.dot(h.astype(jnp.bfloat16), w2_ref[...],
                preferred_element_type=jnp.float32) + b2_ref[...] + x
    mu = jnp.mean(y, axis=-1, keepdims=True)
    var = jnp.mean((y - mu) * (y - mu), axis=-1, keepdims=True)
    o_ref[...] = (y - mu) * jax.lax.rsqrt(var + 1e-5) * g_ref[...] + bb_ref[...]


def ffn_add_layernorm(x, w1, b1, w2, b2, gamma, beta):
    """LayerNorm(relu(x@w1+b1)@w2 + b2 + x); (tm,hidden) stays in VMEM."""
    M, E = x.shape
    H = w1.shape[1]
    tm = _pick_tile(M, _SUB_TILES)
    return pl.pallas_call(
        _ffn_add_ln_kernel,
        out_shape=jax.ShapeDtypeStruct((M, E), jnp.float32),
        grid=(M // tm,),
        in_specs=[
            pl.BlockSpec((tm, E), lambda i: (i, 0)),
            pl.BlockSpec((E, H), lambda i: (0, 0)),
            pl.BlockSpec((1, H), lambda i: (0, 0)),
            pl.BlockSpec((H, E), lambda i: (0, 0)),
            pl.BlockSpec((1, E), lambda i: (0, 0)),
            pl.BlockSpec((1, E), lambda i: (0, 0)),
            pl.BlockSpec((1, E), lambda i: (0, 0)),
        ],
        out_specs=pl.BlockSpec((tm, E), lambda i: (i, 0)),
        compiler_params=_cparams(("parallel",)),
    )(x.astype(jnp.float32), w1.astype(jnp.bfloat16),
      b1.reshape(1, H).astype(jnp.float32), w2.astype(jnp.bfloat16),
      b2.reshape(1, E).astype(jnp.float32),
      gamma.reshape(1, E).astype(jnp.float32),
      beta.reshape(1, E).astype(jnp.float32))


# ----------------------------------------------------------------------------
# Model composition (glue reshapes in plain JAX)
# ----------------------------------------------------------------------------
def attention_block(p, q_in, kv_in, heads, *, causal, fused_qkv):
    """Multi-head attention core (intended semantics of reference
    SelfAttention). Returns concatenated head outputs (B,Sq,E) in bf16; the
    fc_out + residual + LayerNorm epilogue is fused into the caller."""
    B, Sq, E = q_in.shape
    Skv = kv_in.shape[1]
    D = E // heads
    q2 = q_in.reshape(B * Sq, E)
    if fused_qkv:   # self-attention: one lane-dense (E,3E) matmul
        qkv = matmul(q2, p["w_qkv"], out_dtype=jnp.bfloat16)      # (B*Sq, 3E)
        qkv = qkv.reshape(B, Sq, 3, heads, D).transpose(2, 0, 3, 1, 4)
        qh = qkv[0].reshape(B * heads, Sq, D)
        kh = qkv[1].reshape(B * heads, Sq, D)
        vh = qkv[2].reshape(B * heads, Sq, D)
    else:           # cross-attention: q from query, k/v from encoder output
        qh = matmul(q2, p["w_q"], out_dtype=jnp.bfloat16)
        qh = qh.reshape(B, Sq, heads, D).transpose(0, 2, 1, 3)
        qh = qh.reshape(B * heads, Sq, D)
        kv = matmul(kv_in.reshape(B * Skv, E), p["w_kv"],
                    out_dtype=jnp.bfloat16)
        kv = kv.reshape(B, Skv, 2, heads, D).transpose(2, 0, 3, 1, 4)
        kh = kv[0].reshape(B * heads, Skv, D)
        vh = kv[1].reshape(B * heads, Skv, D)
    scale = 1.0 / math.sqrt(E)   # reference scales by embed_size, not head_dim
    oh = flash_attention(qh, kh, vh, scale=scale, causal=causal)  # (B*H,Sq,D)
    # TODO(synk): head merge kept as a tiny XLA transpose; writing (B,Sq,H,D)
    # straight from the attention out_spec would need a sub-128-lane block.
    return oh.reshape(B, heads, Sq, D).transpose(0, 2, 1, 3).reshape(B, Sq, E)


def decoder_block(p, x, enc, heads):
    B, St, E = x.shape
    tb = p["tblock"]
    # masked self-attention -> fused (fc_out + residual + LayerNorm)
    sa = attention_block(p["self_attn"], x, x, heads, causal=True,
                         fused_qkv=True)
    query = linear_add_layernorm(sa.reshape(B * St, E), p["self_attn"]["fc_w"],
                                 p["self_attn"]["fc_b"], x.reshape(B * St, E),
                                 p["n_g"], p["n_b"]).reshape(B, St, E)
    # cross-attention over encoder output (all-ones src_mask -> no masking)
    ca = attention_block(tb["attn"], query, enc, heads, causal=False,
                         fused_qkv=False)
    x2 = linear_add_layernorm(ca.reshape(B * St, E), tb["attn"]["fc_w"],
                              tb["attn"]["fc_b"], query.reshape(B * St, E),
                              tb["n1_g"], tb["n1_b"])
    # feed-forward + residual + LayerNorm, fully fused
    out = ffn_add_layernorm(x2, tb["ff_w1"], tb["ff_b1"], tb["ff_w2"],
                            tb["ff_b2"], tb["n2_g"], tb["n2_b"])
    return out.reshape(B, St, E)


def decoder_forward(params, x_tokens, enc_out, heads):
    """Decoder.forward. Dropout = identity (eval). Target self-attention uses
    the standard causal tag_mask (generated in-kernel); cross-attention uses
    the all-ones src_mask (i.e. no masking).
    TODO(synk): arbitrary dense attention masks would need a DMA'd-mask kernel
    variant, omitted per the perf review (masks here are causal / all-ones)."""
    B, S = x_tokens.shape
    positions = jnp.arange(S, dtype=jnp.int32)[None, :]
    # embedding gathers kept in plain JAX (glue)
    x = params["word_emb"][x_tokens] + params["pos_emb"][positions]
    for lp in params["layers"]:
        x = decoder_block(lp, x, enc_out, heads)
    E = x.shape[-1]
    logits = matmul(x.reshape(B * S, E), params["fc_w"], params["fc_b"])
    return logits.reshape(B, S, -1)


# ----------------------------------------------------------------------------
# Deterministic parameter init (fused lane-dense weights built once)
# ----------------------------------------------------------------------------
def _rnd(key, shape, scale=0.02):
    return scale * jax.random.normal(key, shape, dtype=jnp.float32)


def _block_diag(w, heads):
    """Per-head (D,D) weight shared across heads -> block-diagonal (E,E)."""
    D = w.shape[0]
    eye = jnp.eye(heads, dtype=w.dtype)
    return (eye[:, None, :, None] * w[None, :, None, :]).reshape(
        heads * D, heads * D)


def init_attention(key, E, heads):
    D = E // heads
    ks = jax.random.split(key, 5)
    bdq = _block_diag(_rnd(ks[0], (D, D)), heads)
    bdk = _block_diag(_rnd(ks[1], (D, D)), heads)
    bdv = _block_diag(_rnd(ks[2], (D, D)), heads)
    return {
        "w_qkv": jnp.concatenate([bdq, bdk, bdv], axis=1).astype(jnp.bfloat16),
        "w_q": bdq.astype(jnp.bfloat16),
        "w_kv": jnp.concatenate([bdk, bdv], axis=1).astype(jnp.bfloat16),
        "fc_w": _rnd(ks[3], (E, E)).astype(jnp.bfloat16),
        "fc_b": _rnd(ks[4], (E,)),
    }


def init_decoder(key, vocab, E, num_layers, heads, fwd_exp, max_len):
    keys = jax.random.split(key, 4 + num_layers)
    params = {
        "word_emb": _rnd(keys[0], (vocab, E), 1.0),
        "pos_emb": _rnd(keys[1], (max_len, E), 1.0),
        "fc_w": _rnd(keys[2], (E, vocab)).astype(jnp.bfloat16),
        "fc_b": _rnd(keys[3], (vocab,)),
        "layers": [],
    }
    for i in range(num_layers):
        ks = jax.random.split(keys[4 + i], 6)
        params["layers"].append({
            "self_attn": init_attention(ks[0], E, heads),
            "n_g": jnp.ones((E,), jnp.float32),
            "n_b": jnp.zeros((E,), jnp.float32),
            "tblock": {
                "attn": init_attention(ks[1], E, heads),
                "n1_g": jnp.ones((E,), jnp.float32),
                "n1_b": jnp.zeros((E,), jnp.float32),
                "n2_g": jnp.ones((E,), jnp.float32),
                "n2_b": jnp.zeros((E,), jnp.float32),
                "ff_w1": _rnd(ks[2], (E, fwd_exp * E)).astype(jnp.bfloat16),
                "ff_b1": _rnd(ks[3], (fwd_exp * E,)),
                "ff_w2": _rnd(ks[4], (fwd_exp * E, E)).astype(jnp.bfloat16),
                "ff_b2": _rnd(ks[5], (E,)),
            },
        })
    return params


# ----------------------------------------------------------------------------
if __name__ == "__main__":
    B, S_TGT, S_SRC = 2, 8, 8
    VOCAB, EMBED, LAYERS, HEADS, FWD_EXP, MAX_LEN = 16, 32, 2, 4, 2, 8

    root = jax.random.PRNGKey(0)
    k_param, k_tok, k_enc = jax.random.split(root, 3)

    params = init_decoder(k_param, VOCAB, EMBED, LAYERS, HEADS, FWD_EXP,
                          MAX_LEN)
    x_tokens = jax.random.randint(k_tok, (B, S_TGT), 0, VOCAB, dtype=jnp.int32)
    enc_out = jax.random.normal(k_enc, (B, S_SRC, EMBED), dtype=jnp.float32)

    fwd = jax.jit(functools.partial(decoder_forward, heads=HEADS))
    out = jax.block_until_ready(fwd(params, x_tokens, enc_out))

    assert out.shape == (B, S_TGT, VOCAB)
    assert bool(jnp.all(jnp.isfinite(out)))
    print("KERNEL_OK")
</pallas_src>

<mosaic_0001>
module attributes {stable_mosaic.version = 11 : i64} {
  func.func @_matmul_kernel(%arg0: i32, %arg1: i32, %arg2: i32, %arg3: memref<16x32xbf16, #tpu.memory_space<vmem>>, %arg4: memref<32x96xbf16, #tpu.memory_space<vmem>>, %arg5: memref<1x96xf32, #tpu.memory_space<vmem>>, %arg6: memref<16x96xbf16, #tpu.memory_space<vmem>>, %arg7: memref<16x96xf32, #tpu.memory_space<vmem>>) attributes {dimension_semantics = [#tpu.dimension_semantics<parallel>, #tpu.dimension_semantics<parallel>, #tpu.dimension_semantics<arbitrary>], iteration_bounds = array<i64: 1, 1, 1>, scalar_prefetch = 0 : i64, scratch_operands = 1 : i64, tpu.core_type = #tpu.core_type<tc>, window_params = [{transform_indices = @transform_0, window_bounds = array<i64: 16, 32>}, {transform_indices = @transform_1, window_bounds = array<i64: 32, 96>}, {transform_indices = @transform_2, window_bounds = array<i64: 1, 96>}, {transform_indices = @transform_3, window_bounds = array<i64: 16, 96>}]} {
    %c0_i32 = arith.constant 0 : i32
    %0 = arith.cmpi eq, %arg2, %c0_i32 : i32
    %1 = arith.extui %0 : i1 to i32
    %c0_i32_0 = arith.constant 0 : i32
    %2 = arith.cmpi ne, %1, %c0_i32_0 : i32
    scf.if %2 {
      %cst_10 = arith.constant 0.000000e+00 : f32
      %12 = vector.broadcast %cst_10 : f32 to vector<16x96xf32>
      %c0_11 = arith.constant 0 : index
      %c0_12 = arith.constant 0 : index
      %13 = vector.load %arg7[%c0_11, %c0_12] : memref<16x96xf32, #tpu.memory_space<vmem>>, vector<16x96xf32>
      tpu.vector_store %arg7[%c0_11, %c0_12], %12 {strides = array<i32>} : memref<16x96xf32, #tpu.memory_space<vmem>>, vector<16x96xf32>,
    } else {
    }
    %c0 = arith.constant 0 : index
    %c0_1 = arith.constant 0 : index
    %3 = vector.load %arg7[%c0, %c0_1] : memref<16x96xf32, #tpu.memory_space<vmem>>, vector<16x96xf32>
    %c0_2 = arith.constant 0 : index
    %c0_3 = arith.constant 0 : index
    %4 = vector.load %arg3[%c0_2, %c0_3] : memref<16x32xbf16, #tpu.memory_space<vmem>>, vector<16x32xbf16>
    %c0_4 = arith.constant 0 : index
    %c0_5 = arith.constant 0 : index
    %5 = vector.load %arg4[%c0_4, %c0_5] : memref<32x96xbf16, #tpu.memory_space<vmem>>, vector<32x96xbf16>
    %cst = arith.constant dense<0.000000e+00> : vector<16x96xf32>
    %6 = tpu.matmul %4, %5, %cst {dimension_numbers = #tpu.dot_dimension_numbers<[1], [0], [0], [1], [0, 0, 1, 1], [], []>} : vector<16x32xbf16>, vector<32x96xbf16>, vector<16x96xf32> -> vector<16x96xf32>
    %7 = arith.addf %3, %6 : vector<16x96xf32>
    %c0_6 = arith.constant 0 : index
    %c0_7 = arith.constant 0 : index
    %8 = vector.load %arg7[%c0_6, %c0_7] : memref<16x96xf32, #tpu.memory_space<vmem>>, vector<16x96xf32>
    tpu.vector_store %arg7[%c0_6, %c0_7], %7 {strides = array<i32>} : memref<16x96xf32, #tpu.memory_space<vmem>>, vector<16x96xf32>,
    %c0_i32_8 = arith.constant 0 : i32
    %9 = arith.cmpi eq, %arg2, %c0_i32_8 : i32
    %10 = arith.extui %9 : i1 to i32
    %c0_i32_9 = arith.constant 0 : i32
    %11 = arith.cmpi ne, %10, %c0_i32_9 : i32
    scf.if %11 {
      %c0_10 = arith.constant 0 : index
      %c0_11 = arith.constant 0 : index
      %12 = vector.load %arg7[%c0_10, %c0_11] : memref<16x96xf32, #tpu.memory_space<vmem>>, vector<16x96xf32>
      %c0_12 = arith.constant 0 : index
      %c0_13 = arith.constant 0 : index
      %13 = vector.load %arg5[%c0_12, %c0_13] : memref<1x96xf32, #tpu.memory_space<vmem>>, vector<1x96xf32>
      %14 = vector.broadcast %13 : vector<1x96xf32> to vector<16x96xf32>
      %15 = arith.addf %12, %14 : vector<16x96xf32>
      %16 = arith.truncf %15 : vector<16x96xf32> to vector<16x96xbf16>
      %c0_14 = arith.constant 0 : index
      %c0_15 = arith.constant 0 : index
      %17 = vector.load %arg6[%c0_14, %c0_15] : memref<16x96xbf16, #tpu.memory_space<vmem>>, vector<16x96xbf16>
      tpu.vector_store %arg6[%c0_14, %c0_15], %16 {strides = array<i32>} : memref<16x96xbf16, #tpu.memory_space<vmem>>, vector<16x96xbf16>,
    } else {
    }
    return
  }
  func.func @transform_0(%arg0: i32, %arg1: i32, %arg2: i32) -> (i32, i32) {
    %c0_i32 = arith.constant 0 : i32
    return %arg0, %arg2 : i32, i32
  }
  func.func @transform_1(%arg0: i32, %arg1: i32, %arg2: i32) -> (i32, i32) {
    %c0_i32 = arith.constant 0 : i32
    return %arg2, %arg1 : i32, i32
  }
  func.func @transform_2(%arg0: i32, %arg1: i32, %arg2: i32) -> (i32, i32) {
    %c0_i32 = arith.constant 0 : i32
    %c0_i32_0 = arith.constant 0 : i32
    return %c0_i32, %arg1 : i32, i32
  }
  func.func @transform_3(%arg0: i32, %arg1: i32, %arg2: i32) -> (i32, i32) {
    %c0_i32 = arith.constant 0 : i32
    return %arg0, %arg1 : i32, i32
  }
}

module attributes {stable_mosaic.version = 11 : i64} {
  func.func @_flash_attn_kernel(%arg0: i32, %arg1: i32, %arg2: i32, %arg3: memref<1x8x8xbf16, #tpu.memory_space<vmem>>, %arg4: memref<1x8x8xbf16, #tpu.memory_space<vmem>>, %arg5: memref<1x8x8xbf16, #tpu.memory_space<vmem>>, %arg6: memref<1x8x8xbf16, #tpu.memory_space<vmem>>, %arg7: memref<8x1xf32, #tpu.memory_space<vmem>>, %arg8: memref<8x1xf32, #tpu.memory_space<vmem>>, %arg9: memref<8x8xf32, #tpu.memory_space<vmem>>) attributes {dimension_semantics = [#tpu.dimension_semantics<parallel>, #tpu.dimension_semantics<parallel>, #tpu.dimension_semantics<arbitrary>], iteration_bounds = array<i64: 8, 1, 1>, scalar_prefetch = 0 : i64, scratch_operands = 3 : i64, tpu.core_type = #tpu.core_type<tc>, window_params = [{transform_indices = @transform_0, window_bounds = array<i64: 1, 8, 8>}, {transform_indices = @transform_1, window_bounds = array<i64: 1, 8, 8>}, {transform_indices = @transform_2, window_bounds = array<i64: 1, 8, 8>}, {transform_indices = @transform_3, window_bounds = array<i64: 1, 8, 8>}]} {
    %c0_i32 = arith.constant 0 : i32
    %0 = arith.cmpi eq, %arg2, %c0_i32 : i32
    %1 = arith.extui %0 : i1 to i32
    %c0_i32_0 = arith.constant 0 : i32
    %2 = arith.cmpi ne, %1, %c0_i32_0 : i32
    scf.if %2 {
      %cst_29 = arith.constant 0xFF800000 : f32
      %49 = vector.broadcast %cst_29 : f32 to vector<8x1xf32>
      %c0_30 = arith.constant 0 : index
      %c0_31 = arith.constant 0 : index
      %50 = vector.load %arg7[%c0_30, %c0_31] : memref<8x1xf32, #tpu.memory_space<vmem>>, vector<8x1xf32>
      tpu.vector_store %arg7[%c0_30, %c0_31], %49 {strides = array<i32>} : memref<8x1xf32, #tpu.memory_space<vmem>>, vector<8x1xf32>,
      %cst_32 = arith.constant 0.000000e+00 : f32
      %51 = vector.broadcast %cst_32 : f32 to vector<8x1xf32>
      %c0_33 = arith.constant 0 : index
      %c0_34 = arith.constant 0 : index
      %52 = vector.load %arg8[%c0_33, %c0_34] : memref<8x1xf32, #tpu.memory_space<vmem>>, vector<8x1xf32>
      tpu.vector_store %arg8[%c0_33, %c0_34], %51 {strides = array<i32>} : memref<8x1xf32, #tpu.memory_space<vmem>>, vector<8x1xf32>,
      %cst_35 = arith.constant 0.000000e+00 : f32
      %53 = vector.broadcast %cst_35 : f32 to vector<8x8xf32>
      %c0_36 = arith.constant 0 : index
      %c0_37 = arith.constant 0 : index
      %54 = vector.load %arg9[%c0_36, %c0_37] : memref<8x8xf32, #tpu.memory_space<vmem>>, vector<8x8xf32>
      tpu.vector_store %arg9[%c0_36, %c0_37], %53 {strides = array<i32>} : memref<8x8xf32, #tpu.memory_space<vmem>>, vector<8x8xf32>,
    } else {
    }
    %c0 = arith.constant 0 : index
    %c0_1 = arith.constant 0 : index
    %c0_2 = arith.constant 0 : index
    %3 = vector.load %arg3[%c0, %c0_1, %c0_2] : memref<1x8x8xbf16, #tpu.memory_space<vmem>>, vector<1x8x8xbf16>
    %4 = vector.shape_cast %3 : vector<1x8x8xbf16> to vector<8x8xbf16>
    %c0_3 = arith.constant 0 : index
    %c0_4 = arith.constant 0 : index
    %c0_5 = arith.constant 0 : index
    %5 = vector.load %arg4[%c0_3, %c0_4, %c0_5] : memref<1x8x8xbf16, #tpu.memory_space<vmem>>, vector<1x8x8xbf16>
    %6 = vector.shape_cast %5 : vector<1x8x8xbf16> to vector<8x8xbf16>
    %c0_6 = arith.constant 0 : index
    %c0_7 = arith.constant 0 : index
    %c0_8 = arith.constant 0 : index
    %7 = vector.load %arg5[%c0_6, %c0_7, %c0_8] : memref<1x8x8xbf16, #tpu.memory_space<vmem>>, vector<1x8x8xbf16>
    %8 = vector.shape_cast %7 : vector<1x8x8xbf16> to vector<8x8xbf16>
    %cst = arith.constant dense<0.000000e+00> : vector<8x8xf32>
    %9 = tpu.matmul %4, %6, %cst {dimension_numbers = #tpu.dot_dimension_numbers<[1], [1], [0], [0], [0, 0, 1, 0], [], []>} : vector<8x8xbf16>, vector<8x8xbf16>, vector<8x8xf32> -> vector<8x8xf32>
    %cst_9 = arith.constant 0.176776692 : f32
    %10 = vector.broadcast %cst_9 : f32 to vector<8x8xf32>
    %11 = arith.mulf %9, %10 : vector<8x8xf32>
    %c8_i32 = arith.constant 8 : i32
    %12 = arith.muli %arg1, %c8_i32 : i32
    %13 = tpu.iota {dimensions = array<i32: 0>} : vector<8x8xi32>
    %14 = vector.broadcast %12 : i32 to vector<8x8xi32>
    %15 = arith.addi %14, %13 : vector<8x8xi32>
    %c8_i32_10 = arith.constant 8 : i32
    %16 = arith.muli %arg2, %c8_i32_10 : i32
    %17 = tpu.iota {dimensions = array<i32: 1>} : vector<8x8xi32>
    %18 = vector.broadcast %16 : i32 to vector<8x8xi32>
    %19 = arith.addi %18, %17 : vector<8x8xi32>
    %20 = arith.cmpi sge, %15, %19 : vector<8x8xi32>
    %cst_11 = arith.constant -1.000000e+20 : f32
    %21 = vector.broadcast %cst_11 : f32 to vector<8x8xf32>
    %22 = arith.select %20, %11, %21 : vector<8x8xi1>, vector<8x8xf32>
    %c0_12 = arith.constant 0 : index
    %c0_13 = arith.constant 0 : index
    %23 = vector.load %arg7[%c0_12, %c0_13] : memref<8x1xf32, #tpu.memory_space<vmem>>, vector<8x1xf32>
    %cst_14 = arith.constant dense<0xFF800000> : vector<8xf32>
    %24 = vector.multi_reduction <maximumf>, %22, %cst_14 [1] : vector<8x8xf32> to vector<8xf32>
    %25 = vector.shape_cast %24 : vector<8xf32> to vector<8x1xf32>
    %26 = arith.maximumf %23, %25 : vector<8x1xf32>
    %27 = arith.subf %23, %26 : vector<8x1xf32>
    %28 = math.exp %27 : vector<8x1xf32>
    %29 = vector.broadcast %26 : vector<8x1xf32> to vector<8x8xf32>
    %30 = arith.subf %22, %29 : vector<8x8xf32>
    %31 = math.exp %30 : vector<8x8xf32>
    %c0_15 = arith.constant 0 : index
    %c0_16 = arith.constant 0 : index
    %32 = vector.load %arg8[%c0_15, %c0_16] : memref<8x1xf32, #tpu.memory_space<vmem>>, vector<8x1xf32>
    %33 = arith.mulf %28, %32 : vector<8x1xf32>
    %cst_17 = arith.constant dense<0.000000e+00> : vector<8xf32>
    %34 = vector.multi_reduction <add>, %31, %cst_17 [1] : vector<8x8xf32> to vector<8xf32>
    %35 = vector.shape_cast %34 : vector<8xf32> to vector<8x1xf32>
    %36 = arith.addf %33, %35 : vector<8x1xf32>
    %c0_18 = arith.constant 0 : index
    %c0_19 = arith.constant 0 : index
    %37 = vector.load %arg8[%c0_18, %c0_19] : memref<8x1xf32, #tpu.memory_space<vmem>>, vector<8x1xf32>
    tpu.vector_store %arg8[%c0_18, %c0_19], %36 {strides = array<i32>} : memref<8x1xf32, #tpu.memory_space<vmem>>, vector<8x1xf32>,
    %c0_20 = arith.constant 0 : index
    %c0_21 = arith.constant 0 : index
    %38 = vector.load %arg9[%c0_20, %c0_21] : memref<8x8xf32, #tpu.memory_space<vmem>>, vector<8x8xf32>
    %39 = vector.broadcast %28 : vector<8x1xf32> to vector<8x8xf32>
    %40 = arith.mulf %39, %38 : vector<8x8xf32>
    %41 = arith.truncf %31 : vector<8x8xf32> to vector<8x8xbf16>
    %cst_22 = arith.constant dense<0.000000e+00> : vector<8x8xf32>
    %42 = tpu.matmul %41, %8, %cst_22 {dimension_numbers = #tpu.dot_dimension_numbers<[1], [0], [0], [1], [0, 0, 1, 1], [], []>} : vector<8x8xbf16>, vector<8x8xbf16>, vector<8x8xf32> -> vector<8x8xf32>
    %43 = arith.addf %40, %42 : vector<8x8xf32>
    %c0_23 = arith.constant 0 : index
    %c0_24 = arith.constant 0 : index
    %44 = vector.load %arg9[%c0_23, %c0_24] : memref<8x8xf32, #tpu.memory_space<vmem>>, vector<8x8xf32>
    tpu.vector_store %arg9[%c0_23, %c0_24], %43 {strides = array<i32>} : memref<8x8xf32, #tpu.memory_space<vmem>>, vector<8x8xf32>,
    %c0_25 = arith.constant 0 : index
    %c0_26 = arith.constant 0 : index
    %45 = vector.load %arg7[%c0_25, %c0_26] : memref<8x1xf32, #tpu.memory_space<vmem>>, vector<8x1xf32>
    tpu.vector_store %arg7[%c0_25, %c0_26], %26 {strides = array<i32>} : memref<8x1xf32, #tpu.memory_space<vmem>>, vector<8x1xf32>,
    %c0_i32_27 = arith.constant 0 : i32
    %46 = arith.cmpi eq, %arg2, %c0_i32_27 : i32
    %47 = arith.extui %46 : i1 to i32
    %c0_i32_28 = arith.constant 0 : i32
    %48 = arith.cmpi ne, %47, %c0_i32_28 : i32
    scf.if %48 {
      %c0_29 = arith.constant 0 : index
      %c0_30 = arith.constant 0 : index
      %49 = vector.load %arg9[%c0_29, %c0_30] : memref<8x8xf32, #tpu.memory_space<vmem>>, vector<8x8xf32>
      %c0_31 = arith.constant 0 : index
      %c0_32 = arith.constant 0 : index
      %50 = vector.load %arg8[%c0_31, %c0_32] : memref<8x1xf32, #tpu.memory_space<vmem>>, vector<8x1xf32>
      %51 = tpu.reciprocal %50 {approx = true} : vector<8x1xf32> -> vector<8x1xf32>
      %52 = vector.broadcast %51 : vector<8x1xf32> to vector<8x8xf32>
      %53 = arith.mulf %49, %52 : vector<8x8xf32>
      %54 = arith.truncf %53 : vector<8x8xf32> to vector<8x8xbf16>
      %c0_33 = arith.constant 0 : index
      %c0_34 = arith.constant 0 : index
      %c0_35 = arith.constant 0 : index
      %55 = vector.load %arg6[%c0_33, %c0_34, %c0_35] : memref<1x8x8xbf16, #tpu.memory_space<vmem>>, vector<1x8x8xbf16>
      %56 = vector.shape_cast %55 : vector<1x8x8xbf16> to vector<8x8xbf16>
      %57 = vector.shape_cast %54 : vector<8x8xbf16> to vector<1x8x8xbf16>
      tpu.vector_store %arg6[%c0_33, %c0_34, %c0_35], %57 {strides = array<i32>} : memref<1x8x8xbf16, #tpu.memory_space<vmem>>, vector<1x8x8xbf16>,
    } else {
    }
    return
  }
  func.func @transform_0(%arg0: i32, %arg1: i32, %arg2: i32) -> (i32, i32, i32) {
    %c0_i32 = arith.constant 0 : i32
    %c0_i32_0 = arith.constant 0 : i32
    return %arg0, %arg1, %c0_i32 : i32, i32, i32
  }
  func.func @transform_1(%arg0: i32, %arg1: i32, %arg2: i32) -> (i32, i32, i32) {
    %c0_i32 = arith.constant 0 : i32
    %c0_i32_0 = arith.constant 0 : i32
    return %arg0, %c0_i32, %arg2 : i32, i32, i32
  }
  func.func @transform_2(%arg0: i32, %arg1: i32, %arg2: i32) -> (i32, i32, i32) {
    %c0_i32 = arith.constant 0 : i32
    %c0_i32_0 = arith.constant 0 : i32
    return %arg0, %c0_i32, %arg2 : i32, i32, i32
  }
  func.func @transform_3(%arg0: i32, %arg1: i32, %arg2: i32) -> (i32, i32, i32) {
    %c0_i32 = arith.constant 0 : i32
    %c0_i32_0 = arith.constant 0 : i32
    return %arg0, %arg1, %c0_i32 : i32, i32, i32
  }
}

module attributes {stable_mosaic.version = 11 : i64} {
  func.func @_linear_add_ln_kernel(%arg0: i32, %arg1: memref<16x32xbf16, #tpu.memory_space<vmem>>, %arg2: memref<32x32xbf16, #tpu.memory_space<vmem>>, %arg3: memref<1x32xf32, #tpu.memory_space<vmem>>, %arg4: memref<16x32xf32, #tpu.memory_space<vmem>>, %arg5: memref<1x32xf32, #tpu.memory_space<vmem>>, %arg6: memref<1x32xf32, #tpu.memory_space<vmem>>, %arg7: memref<16x32xf32, #tpu.memory_space<vmem>>) attributes {dimension_semantics = [#tpu.dimension_semantics<parallel>], iteration_bounds = array<i64: 1>, scalar_prefetch = 0 : i64, scratch_operands = 0 : i64, tpu.core_type = #tpu.core_type<tc>, window_params = [{transform_indices = @transform_0, window_bounds = array<i64: 16, 32>}, {pipeline_mode = #tpu.pipeline_mode<synchronous>, transform_indices = @transform_1, window_bounds = array<i64: 32, 32>}, {pipeline_mode = #tpu.pipeline_mode<synchronous>, transform_indices = @transform_2, window_bounds = array<i64: 1, 32>}, {transform_indices = @transform_3, window_bounds = array<i64: 16, 32>}, {pipeline_mode = #tpu.pipeline_mode<synchronous>, transform_indices = @transform_4, window_bounds = array<i64: 1, 32>}, {pipeline_mode = #tpu.pipeline_mode<synchronous>, transform_indices = @transform_5, window_bounds = array<i64: 1, 32>}, {transform_indices = @transform_6, window_bounds = array<i64: 16, 32>}]} {
    %c0 = arith.constant 0 : index
    %c0_0 = arith.constant 0 : index
    %0 = vector.load %arg1[%c0, %c0_0] : memref<16x32xbf16, #tpu.memory_space<vmem>>, vector<16x32xbf16>
    %c0_1 = arith.constant 0 : index
    %c0_2 = arith.constant 0 : index
    %1 = vector.load %arg2[%c0_1, %c0_2] : memref<32x32xbf16, #tpu.memory_space<vmem>>, vector<32x32xbf16>
    %cst = arith.constant dense<0.000000e+00> : vector<16x32xf32>
    %2 = tpu.matmul %0, %1, %cst {dimension_numbers = #tpu.dot_dimension_numbers<[1], [0], [0], [1], [0, 0, 1, 1], [], []>} : vector<16x32xbf16>, vector<32x32xbf16>, vector<16x32xf32> -> vector<16x32xf32>
    %c0_3 = arith.constant 0 : index
    %c0_4 = arith.constant 0 : index
    %3 = vector.load %arg3[%c0_3, %c0_4] : memref<1x32xf32, #tpu.memory_space<vmem>>, vector<1x32xf32>
    %4 = vector.broadcast %3 : vector<1x32xf32> to vector<16x32xf32>
    %5 = arith.addf %2, %4 : vector<16x32xf32>
    %c0_5 = arith.constant 0 : index
    %c0_6 = arith.constant 0 : index
    %6 = vector.load %arg4[%c0_5, %c0_6] : memref<16x32xf32, #tpu.memory_space<vmem>>, vector<16x32xf32>
    %7 = arith.addf %5, %6 : vector<16x32xf32>
    %cst_7 = arith.constant dense<0.000000e+00> : vector<16xf32>
    %8 = vector.multi_reduction <add>, %7, %cst_7 [1] : vector<16x32xf32> to vector<16xf32>
    %9 = vector.shape_cast %8 : vector<16xf32> to vector<16x1xf32>
    %cst_8 = arith.constant 3.200000e+01 : f32
    %10 = vector.broadcast %cst_8 : f32 to vector<16x1xf32>
    %11 = arith.divf %9, %10 : vector<16x1xf32>
    %12 = vector.broadcast %11 : vector<16x1xf32> to vector<16x32xf32>
    %13 = arith.subf %7, %12 : vector<16x32xf32>
    %14 = vector.broadcast %11 : vector<16x1xf32> to vector<16x32xf32>
    %15 = arith.subf %7, %14 : vector<16x32xf32>
    %16 = arith.mulf %13, %15 : vector<16x32xf32>
    %cst_9 = arith.constant dense<0.000000e+00> : vector<16xf32>
    %17 = vector.multi_reduction <add>, %16, %cst_9 [1] : vector<16x32xf32> to vector<16xf32>
    %18 = vector.shape_cast %17 : vector<16xf32> to vector<16x1xf32>
    %cst_10 = arith.constant 3.200000e+01 : f32
    %19 = vector.broadcast %cst_10 : f32 to vector<16x1xf32>
    %20 = arith.divf %18, %19 : vector<16x1xf32>
    %21 = vector.broadcast %11 : vector<16x1xf32> to vector<16x32xf32>
    %22 = arith.subf %7, %21 : vector<16x32xf32>
    %cst_11 = arith.constant 9.99999974E-6 : f32
    %23 = vector.broadcast %cst_11 : f32 to vector<16x1xf32>
    %24 = arith.addf %20, %23 : vector<16x1xf32>
    %25 = math.rsqrt %24 : vector<16x1xf32>
    %26 = vector.broadcast %25 : vector<16x1xf32> to vector<16x32xf32>
    %27 = arith.mulf %22, %26 : vector<16x32xf32>
    %c0_12 = arith.constant 0 : index
    %c0_13 = arith.constant 0 : index
    %28 = vector.load %arg5[%c0_12, %c0_13] : memref<1x32xf32, #tpu.memory_space<vmem>>, vector<1x32xf32>
    %29 = vector.broadcast %28 : vector<1x32xf32> to vector<16x32xf32>
    %30 = arith.mulf %27, %29 : vector<16x32xf32>
    %c0_14 = arith.constant 0 : index
    %c0_15 = arith.constant 0 : index
    %31 = vector.load %arg6[%c0_14, %c0_15] : memref<1x32xf32, #tpu.memory_space<vmem>>, vector<1x32xf32>
    %32 = vector.broadcast %31 : vector<1x32xf32> to vector<16x32xf32>
    %33 = arith.addf %30, %32 : vector<16x32xf32>
    %c0_16 = arith.constant 0 : index
    %c0_17 = arith.constant 0 : index
    %34 = vector.load %arg7[%c0_16, %c0_17] : memref<16x32xf32, #tpu.memory_space<vmem>>, vector<16x32xf32>
    tpu.vector_store %arg7[%c0_16, %c0_17], %33 {strides = array<i32>} : memref<16x32xf32, #tpu.memory_space<vmem>>, vector<16x32xf32>,
    return
  }
  func.func @transform_0(%arg0: i32) -> (i32, i32) {
    %c0_i32 = arith.constant 0 : i32
    %c0_i32_0 = arith.constant 0 : i32
    return %arg0, %c0_i32 : i32, i32
  }
  func.func @transform_1(%arg0: i32) -> (i32, i32) {
    %c0_i32 = arith.constant 0 : i32
    %c0_i32_0 = arith.constant 0 : i32
    %c0_i32_1 = arith.constant 0 : i32
    return %c0_i32, %c0_i32_0 : i32, i32
  }
  func.func @transform_2(%arg0: i32) -> (i32, i32) {
    %c0_i32 = arith.constant 0 : i32
    %c0_i32_0 = arith.constant 0 : i32
    %c0_i32_1 = arith.constant 0 : i32
    return %c0_i32, %c0_i32_0 : i32, i32
  }
  func.func @transform_3(%arg0: i32) -> (i32, i32) {
    %c0_i32 = arith.constant 0 : i32
    %c0_i32_0 = arith.constant 0 : i32
    return %arg0, %c0_i32 : i32, i32
  }
  func.func @transform_4(%arg0: i32) -> (i32, i32) {
    %c0_i32 = arith.constant 0 : i32
    %c0_i32_0 = arith.constant 0 : i32
    %c0_i32_1 = arith.constant 0 : i32
    return %c0_i32, %c0_i32_0 : i32, i32
  }
  func.func @transform_5(%arg0: i32) -> (i32, i32) {
    %c0_i32 = arith.constant 0 : i32
    %c0_i32_0 = arith.constant 0 : i32
    %c0_i32_1 = arith.constant 0 : i32
    return %c0_i32, %c0_i32_0 : i32, i32
  }
  func.func @transform_6(%arg0: i32) -> (i32, i32) {
    %c0_i32 = arith.constant 0 : i32
    %c0_i32_0 = arith.constant 0 : i32
    return %arg0, %c0_i32 : i32, i32
  }
}

module attributes {stable_mosaic.version = 11 : i64} {
  func.func @_matmul_kernel(%arg0: i32, %arg1: i32, %arg2: i32, %arg3: memref<16x32xbf16, #tpu.memory_space<vmem>>, %arg4: memref<32x32xbf16, #tpu.memory_space<vmem>>, %arg5: memref<1x32xf32, #tpu.memory_space<vmem>>, %arg6: memref<16x32xbf16, #tpu.memory_space<vmem>>, %arg7: memref<16x32xf32, #tpu.memory_space<vmem>>) attributes {dimension_semantics = [#tpu.dimension_semantics<parallel>, #tpu.dimension_semantics<parallel>, #tpu.dimension_semantics<arbitrary>], iteration_bounds = array<i64: 1, 1, 1>, scalar_prefetch = 0 : i64, scratch_operands = 1 : i64, tpu.core_type = #tpu.core_type<tc>, window_params = [{transform_indices = @transform_0, window_bounds = array<i64: 16, 32>}, {transform_indices = @transform_1, window_bounds = array<i64: 32, 32>}, {transform_indices = @transform_2, window_bounds = array<i64: 1, 32>}, {transform_indices = @transform_3, window_bounds = array<i64: 16, 32>}]} {
    %c0_i32 = arith.constant 0 : i32
    %0 = arith.cmpi eq, %arg2, %c0_i32 : i32
    %1 = arith.extui %0 : i1 to i32
    %c0_i32_0 = arith.constant 0 : i32
    %2 = arith.cmpi ne, %1, %c0_i32_0 : i32
    scf.if %2 {
      %cst_10 = arith.constant 0.000000e+00 : f32
      %12 = vector.broadcast %cst_10 : f32 to vector<16x32xf32>
      %c0_11 = arith.constant 0 : index
      %c0_12 = arith.constant 0 : index
      %13 = vector.load %arg7[%c0_11, %c0_12] : memref<16x32xf32, #tpu.memory_space<vmem>>, vector<16x32xf32>
      tpu.vector_store %arg7[%c0_11, %c0_12], %12 {strides = array<i32>} : memref<16x32xf32, #tpu.memory_space<vmem>>, vector<16x32xf32>,
    } else {
    }
    %c0 = arith.constant 0 : index
    %c0_1 = arith.constant 0 : index
    %3 = vector.load %arg7[%c0, %c0_1] : memref<16x32xf32, #tpu.memory_space<vmem>>, vector<16x32xf32>
    %c0_2 = arith.constant 0 : index
    %c0_3 = arith.constant 0 : index
    %4 = vector.load %arg3[%c0_2, %c0_3] : memref<16x32xbf16, #tpu.memory_space<vmem>>, vector<16x32xbf16>
    %c0_4 = arith.constant 0 : index
    %c0_5 = arith.constant 0 : index
    %5 = vector.load %arg4[%c0_4, %c0_5] : memref<32x32xbf16, #tpu.memory_space<vmem>>, vector<32x32xbf16>
    %cst = arith.constant dense<0.000000e+00> : vector<16x32xf32>
    %6 = tpu.matmul %4, %5, %cst {dimension_numbers = #tpu.dot_dimension_numbers<[1], [0], [0], [1], [0, 0, 1, 1], [], []>} : vector<16x32xbf16>, vector<32x32xbf16>, vector<16x32xf32> -> vector<16x32xf32>
    %7 = arith.addf %3, %6 : vector<16x32xf32>
    %c0_6 = arith.constant 0 : index
    %c0_7 = arith.constant 0 : index
    %8 = vector.load %arg7[%c0_6, %c0_7] : memref<16x32xf32, #tpu.memory_space<vmem>>, vector<16x32xf32>
    tpu.vector_store %arg7[%c0_6, %c0_7], %7 {strides = array<i32>} : memref<16x32xf32, #tpu.memory_space<vmem>>, vector<16x32xf32>,
    %c0_i32_8 = arith.constant 0 : i32
    %9 = arith.cmpi eq, %arg2, %c0_i32_8 : i32
    %10 = arith.extui %9 : i1 to i32
    %c0_i32_9 = arith.constant 0 : i32
    %11 = arith.cmpi ne, %10, %c0_i32_9 : i32
    scf.if %11 {
      %c0_10 = arith.constant 0 : index
      %c0_11 = arith.constant 0 : index
      %12 = vector.load %arg7[%c0_10, %c0_11] : memref<16x32xf32, #tpu.memory_space<vmem>>, vector<16x32xf32>
      %c0_12 = arith.constant 0 : index
      %c0_13 = arith.constant 0 : index
      %13 = vector.load %arg5[%c0_12, %c0_13] : memref<1x32xf32, #tpu.memory_space<vmem>>, vector<1x32xf32>
      %14 = vector.broadcast %13 : vector<1x32xf32> to vector<16x32xf32>
      %15 = arith.addf %12, %14 : vector<16x32xf32>
      %16 = arith.truncf %15 : vector<16x32xf32> to vector<16x32xbf16>
      %c0_14 = arith.constant 0 : index
      %c0_15 = arith.constant 0 : index
      %17 = vector.load %arg6[%c0_14, %c0_15] : memref<16x32xbf16, #tpu.memory_space<vmem>>, vector<16x32xbf16>
      tpu.vector_store %arg6[%c0_14, %c0_15], %16 {strides = array<i32>} : memref<16x32xbf16, #tpu.memory_space<vmem>>, vector<16x32xbf16>,
    } else {
    }
    return
  }
  func.func @transform_0(%arg0: i32, %arg1: i32, %arg2: i32) -> (i32, i32) {
    %c0_i32 = arith.constant 0 : i32
    return %arg0, %arg2 : i32, i32
  }
  func.func @transform_1(%arg0: i32, %arg1: i32, %arg2: i32) -> (i32, i32) {
    %c0_i32 = arith.constant 0 : i32
    return %arg2, %arg1 : i32, i32
  }
  func.func @transform_2(%arg0: i32, %arg1: i32, %arg2: i32) -> (i32, i32) {
    %c0_i32 = arith.constant 0 : i32
    %c0_i32_0 = arith.constant 0 : i32
    return %c0_i32, %arg1 : i32, i32
  }
  func.func @transform_3(%arg0: i32, %arg1: i32, %arg2: i32) -> (i32, i32) {
    %c0_i32 = arith.constant 0 : i32
    return %arg0, %arg1 : i32, i32
  }
}

module attributes {stable_mosaic.version = 11 : i64} {
  func.func @_matmul_kernel(%arg0: i32, %arg1: i32, %arg2: i32, %arg3: memref<16x32xbf16, #tpu.memory_space<vmem>>, %arg4: memref<32x64xbf16, #tpu.memory_space<vmem>>, %arg5: memref<1x64xf32, #tpu.memory_space<vmem>>, %arg6: memref<16x64xbf16, #tpu.memory_space<vmem>>, %arg7: memref<16x64xf32, #tpu.memory_space<vmem>>) attributes {dimension_semantics = [#tpu.dimension_semantics<parallel>, #tpu.dimension_semantics<parallel>, #tpu.dimension_semantics<arbitrary>], iteration_bounds = array<i64: 1, 1, 1>, scalar_prefetch = 0 : i64, scratch_operands = 1 : i64, tpu.core_type = #tpu.core_type<tc>, window_params = [{transform_indices = @transform_0, window_bounds = array<i64: 16, 32>}, {transform_indices = @transform_1, window_bounds = array<i64: 32, 64>}, {transform_indices = @transform_2, window_bounds = array<i64: 1, 64>}, {transform_indices = @transform_3, window_bounds = array<i64: 16, 64>}]} {
    %c0_i32 = arith.constant 0 : i32
    %0 = arith.cmpi eq, %arg2, %c0_i32 : i32
    %1 = arith.extui %0 : i1 to i32
    %c0_i32_0 = arith.constant 0 : i32
    %2 = arith.cmpi ne, %1, %c0_i32_0 : i32
    scf.if %2 {
      %cst_10 = arith.constant 0.000000e+00 : f32
      %12 = vector.broadcast %cst_10 : f32 to vector<16x64xf32>
      %c0_11 = arith.constant 0 : index
      %c0_12 = arith.constant 0 : index
      %13 = vector.load %arg7[%c0_11, %c0_12] : memref<16x64xf32, #tpu.memory_space<vmem>>, vector<16x64xf32>
      tpu.vector_store %arg7[%c0_11, %c0_12], %12 {strides = array<i32>} : memref<16x64xf32, #tpu.memory_space<vmem>>, vector<16x64xf32>,
    } else {
    }
    %c0 = arith.constant 0 : index
    %c0_1 = arith.constant 0 : index
    %3 = vector.load %arg7[%c0, %c0_1] : memref<16x64xf32, #tpu.memory_space<vmem>>, vector<16x64xf32>
    %c0_2 = arith.constant 0 : index
    %c0_3 = arith.constant 0 : index
    %4 = vector.load %arg3[%c0_2, %c0_3] : memref<16x32xbf16, #tpu.memory_space<vmem>>, vector<16x32xbf16>
    %c0_4 = arith.constant 0 : index
    %c0_5 = arith.constant 0 : index
    %5 = vector.load %arg4[%c0_4, %c0_5] : memref<32x64xbf16, #tpu.memory_space<vmem>>, vector<32x64xbf16>
    %cst = arith.constant dense<0.000000e+00> : vector<16x64xf32>
    %6 = tpu.matmul %4, %5, %cst {dimension_numbers = #tpu.dot_dimension_numbers<[1], [0], [0], [1], [0, 0, 1, 1], [], []>} : vector<16x32xbf16>, vector<32x64xbf16>, vector<16x64xf32> -> vector<16x64xf32>
    %7 = arith.addf %3, %6 : vector<16x64xf32>
    %c0_6 = arith.constant 0 : index
    %c0_7 = arith.constant 0 : index
    %8 = vector.load %arg7[%c0_6, %c0_7] : memref<16x64xf32, #tpu.memory_space<vmem>>, vector<16x64xf32>
    tpu.vector_store %arg7[%c0_6, %c0_7], %7 {strides = array<i32>} : memref<16x64xf32, #tpu.memory_space<vmem>>, vector<16x64xf32>,
    %c0_i32_8 = arith.constant 0 : i32
    %9 = arith.cmpi eq, %arg2, %c0_i32_8 : i32
    %10 = arith.extui %9 : i1 to i32
    %c0_i32_9 = arith.constant 0 : i32
    %11 = arith.cmpi ne, %10, %c0_i32_9 : i32
    scf.if %11 {
      %c0_10 = arith.constant 0 : index
      %c0_11 = arith.constant 0 : index
      %12 = vector.load %arg7[%c0_10, %c0_11] : memref<16x64xf32, #tpu.memory_space<vmem>>, vector<16x64xf32>
      %c0_12 = arith.constant 0 : index
      %c0_13 = arith.constant 0 : index
      %13 = vector.load %arg5[%c0_12, %c0_13] : memref<1x64xf32, #tpu.memory_space<vmem>>, vector<1x64xf32>
      %14 = vector.broadcast %13 : vector<1x64xf32> to vector<16x64xf32>
      %15 = arith.addf %12, %14 : vector<16x64xf32>
      %16 = arith.truncf %15 : vector<16x64xf32> to vector<16x64xbf16>
      %c0_14 = arith.constant 0 : index
      %c0_15 = arith.constant 0 : index
      %17 = vector.load %arg6[%c0_14, %c0_15] : memref<16x64xbf16, #tpu.memory_space<vmem>>, vector<16x64xbf16>
      tpu.vector_store %arg6[%c0_14, %c0_15], %16 {strides = array<i32>} : memref<16x64xbf16, #tpu.memory_space<vmem>>, vector<16x64xbf16>,
    } else {
    }
    return
  }
  func.func @transform_0(%arg0: i32, %arg1: i32, %arg2: i32) -> (i32, i32) {
    %c0_i32 = arith.constant 0 : i32
    return %arg0, %arg2 : i32, i32
  }
  func.func @transform_1(%arg0: i32, %arg1: i32, %arg2: i32) -> (i32, i32) {
    %c0_i32 = arith.constant 0 : i32
    return %arg2, %arg1 : i32, i32
  }
  func.func @transform_2(%arg0: i32, %arg1: i32, %arg2: i32) -> (i32, i32) {
    %c0_i32 = arith.constant 0 : i32
    %c0_i32_0 = arith.constant 0 : i32
    return %c0_i32, %arg1 : i32, i32
  }
  func.func @transform_3(%arg0: i32, %arg1: i32, %arg2: i32) -> (i32, i32) {
    %c0_i32 = arith.constant 0 : i32
    return %arg0, %arg1 : i32, i32
  }
}

module attributes {stable_mosaic.version = 11 : i64} {
  func.func @_flash_attn_kernel(%arg0: i32, %arg1: i32, %arg2: i32, %arg3: memref<1x8x8xbf16, #tpu.memory_space<vmem>>, %arg4: memref<1x8x8xbf16, #tpu.memory_space<vmem>>, %arg5: memref<1x8x8xbf16, #tpu.memory_space<vmem>>, %arg6: memref<1x8x8xbf16, #tpu.memory_space<vmem>>, %arg7: memref<8x1xf32, #tpu.memory_space<vmem>>, %arg8: memref<8x1xf32, #tpu.memory_space<vmem>>, %arg9: memref<8x8xf32, #tpu.memory_space<vmem>>) attributes {dimension_semantics = [#tpu.dimension_semantics<parallel>, #tpu.dimension_semantics<parallel>, #tpu.dimension_semantics<arbitrary>], iteration_bounds = array<i64: 8, 1, 1>, scalar_prefetch = 0 : i64, scratch_operands = 3 : i64, tpu.core_type = #tpu.core_type<tc>, window_params = [{transform_indices = @transform_0, window_bounds = array<i64: 1, 8, 8>}, {transform_indices = @transform_1, window_bounds = array<i64: 1, 8, 8>}, {transform_indices = @transform_2, window_bounds = array<i64: 1, 8, 8>}, {transform_indices = @transform_3, window_bounds = array<i64: 1, 8, 8>}]} {
    %c0_i32 = arith.constant 0 : i32
    %0 = arith.cmpi eq, %arg2, %c0_i32 : i32
    %1 = arith.extui %0 : i1 to i32
    %c0_i32_0 = arith.constant 0 : i32
    %2 = arith.cmpi ne, %1, %c0_i32_0 : i32
    scf.if %2 {
      %cst_27 = arith.constant 0xFF800000 : f32
      %38 = vector.broadcast %cst_27 : f32 to vector<8x1xf32>
      %c0_28 = arith.constant 0 : index
      %c0_29 = arith.constant 0 : index
      %39 = vector.load %arg7[%c0_28, %c0_29] : memref<8x1xf32, #tpu.memory_space<vmem>>, vector<8x1xf32>
      tpu.vector_store %arg7[%c0_28, %c0_29], %38 {strides = array<i32>} : memref<8x1xf32, #tpu.memory_space<vmem>>, vector<8x1xf32>,
      %cst_30 = arith.constant 0.000000e+00 : f32
      %40 = vector.broadcast %cst_30 : f32 to vector<8x1xf32>
      %c0_31 = arith.constant 0 : index
      %c0_32 = arith.constant 0 : index
      %41 = vector.load %arg8[%c0_31, %c0_32] : memref<8x1xf32, #tpu.memory_space<vmem>>, vector<8x1xf32>
      tpu.vector_store %arg8[%c0_31, %c0_32], %40 {strides = array<i32>} : memref<8x1xf32, #tpu.memory_space<vmem>>, vector<8x1xf32>,
      %cst_33 = arith.constant 0.000000e+00 : f32
      %42 = vector.broadcast %cst_33 : f32 to vector<8x8xf32>
      %c0_34 = arith.constant 0 : index
      %c0_35 = arith.constant 0 : index
      %43 = vector.load %arg9[%c0_34, %c0_35] : memref<8x8xf32, #tpu.memory_space<vmem>>, vector<8x8xf32>
      tpu.vector_store %arg9[%c0_34, %c0_35], %42 {strides = array<i32>} : memref<8x8xf32, #tpu.memory_space<vmem>>, vector<8x8xf32>,
    } else {
    }
    %c0 = arith.constant 0 : index
    %c0_1 = arith.constant 0 : index
    %c0_2 = arith.constant 0 : index
    %3 = vector.load %arg3[%c0, %c0_1, %c0_2] : memref<1x8x8xbf16, #tpu.memory_space<vmem>>, vector<1x8x8xbf16>
    %4 = vector.shape_cast %3 : vector<1x8x8xbf16> to vector<8x8xbf16>
    %c0_3 = arith.constant 0 : index
    %c0_4 = arith.constant 0 : index
    %c0_5 = arith.constant 0 : index
    %5 = vector.load %arg4[%c0_3, %c0_4, %c0_5] : memref<1x8x8xbf16, #tpu.memory_space<vmem>>, vector<1x8x8xbf16>
    %6 = vector.shape_cast %5 : vector<1x8x8xbf16> to vector<8x8xbf16>
    %c0_6 = arith.constant 0 : index
    %c0_7 = arith.constant 0 : index
    %c0_8 = arith.constant 0 : index
    %7 = vector.load %arg5[%c0_6, %c0_7, %c0_8] : memref<1x8x8xbf16, #tpu.memory_space<vmem>>, vector<1x8x8xbf16>
    %8 = vector.shape_cast %7 : vector<1x8x8xbf16> to vector<8x8xbf16>
    %cst = arith.constant dense<0.000000e+00> : vector<8x8xf32>
    %9 = tpu.matmul %4, %6, %cst {dimension_numbers = #tpu.dot_dimension_numbers<[1], [1], [0], [0], [0, 0, 1, 0], [], []>} : vector<8x8xbf16>, vector<8x8xbf16>, vector<8x8xf32> -> vector<8x8xf32>
    %cst_9 = arith.constant 0.176776692 : f32
    %10 = vector.broadcast %cst_9 : f32 to vector<8x8xf32>
    %11 = arith.mulf %9, %10 : vector<8x8xf32>
    %c0_10 = arith.constant 0 : index
    %c0_11 = arith.constant 0 : index
    %12 = vector.load %arg7[%c0_10, %c0_11] : memref<8x1xf32, #tpu.memory_space<vmem>>, vector<8x1xf32>
    %cst_12 = arith.constant dense<0xFF800000> : vector<8xf32>
    %13 = vector.multi_reduction <maximumf>, %11, %cst_12 [1] : vector<8x8xf32> to vector<8xf32>
    %14 = vector.shape_cast %13 : vector<8xf32> to vector<8x1xf32>
    %15 = arith.maximumf %12, %14 : vector<8x1xf32>
    %16 = arith.subf %12, %15 : vector<8x1xf32>
    %17 = math.exp %16 : vector<8x1xf32>
    %18 = vector.broadcast %15 : vector<8x1xf32> to vector<8x8xf32>
    %19 = arith.subf %11, %18 : vector<8x8xf32>
    %20 = math.exp %19 : vector<8x8xf32>
    %c0_13 = arith.constant 0 : index
    %c0_14 = arith.constant 0 : index
    %21 = vector.load %arg8[%c0_13, %c0_14] : memref<8x1xf32, #tpu.memory_space<vmem>>, vector<8x1xf32>
    %22 = arith.mulf %17, %21 : vector<8x1xf32>
    %cst_15 = arith.constant dense<0.000000e+00> : vector<8xf32>
    %23 = vector.multi_reduction <add>, %20, %cst_15 [1] : vector<8x8xf32> to vector<8xf32>
    %24 = vector.shape_cast %23 : vector<8xf32> to vector<8x1xf32>
    %25 = arith.addf %22, %24 : vector<8x1xf32>
    %c0_16 = arith.constant 0 : index
    %c0_17 = arith.constant 0 : index
    %26 = vector.load %arg8[%c0_16, %c0_17] : memref<8x1xf32, #tpu.memory_space<vmem>>, vector<8x1xf32>
    tpu.vector_store %arg8[%c0_16, %c0_17], %25 {strides = array<i32>} : memref<8x1xf32, #tpu.memory_space<vmem>>, vector<8x1xf32>,
    %c0_18 = arith.constant 0 : index
    %c0_19 = arith.constant 0 : index
    %27 = vector.load %arg9[%c0_18, %c0_19] : memref<8x8xf32, #tpu.memory_space<vmem>>, vector<8x8xf32>
    %28 = vector.broadcast %17 : vector<8x1xf32> to vector<8x8xf32>
    %29 = arith.mulf %28, %27 : vector<8x8xf32>
    %30 = arith.truncf %20 : vector<8x8xf32> to vector<8x8xbf16>
    %cst_20 = arith.constant dense<0.000000e+00> : vector<8x8xf32>
    %31 = tpu.matmul %30, %8, %cst_20 {dimension_numbers = #tpu.dot_dimension_numbers<[1], [0], [0], [1], [0, 0, 1, 1], [], []>} : vector<8x8xbf16>, vector<8x8xbf16>, vector<8x8xf32> -> vector<8x8xf32>
    %32 = arith.addf %29, %31 : vector<8x8xf32>
    %c0_21 = arith.constant 0 : index
    %c0_22 = arith.constant 0 : index
    %33 = vector.load %arg9[%c0_21, %c0_22] : memref<8x8xf32, #tpu.memory_space<vmem>>, vector<8x8xf32>
    tpu.vector_store %arg9[%c0_21, %c0_22], %32 {strides = array<i32>} : memref<8x8xf32, #tpu.memory_space<vmem>>, vector<8x8xf32>,
    %c0_23 = arith.constant 0 : index
    %c0_24 = arith.constant 0 : index
    %34 = vector.load %arg7[%c0_23, %c0_24] : memref<8x1xf32, #tpu.memory_space<vmem>>, vector<8x1xf32>
    tpu.vector_store %arg7[%c0_23, %c0_24], %15 {strides = array<i32>} : memref<8x1xf32, #tpu.memory_space<vmem>>, vector<8x1xf32>,
    %c0_i32_25 = arith.constant 0 : i32
    %35 = arith.cmpi eq, %arg2, %c0_i32_25 : i32
    %36 = arith.extui %35 : i1 to i32
    %c0_i32_26 = arith.constant 0 : i32
    %37 = arith.cmpi ne, %36, %c0_i32_26 : i32
    scf.if %37 {
      %c0_27 = arith.constant 0 : index
      %c0_28 = arith.constant 0 : index
      %38 = vector.load %arg9[%c0_27, %c0_28] : memref<8x8xf32, #tpu.memory_space<vmem>>, vector<8x8xf32>
      %c0_29 = arith.constant 0 : index
      %c0_30 = arith.constant 0 : index
      %39 = vector.load %arg8[%c0_29, %c0_30] : memref<8x1xf32, #tpu.memory_space<vmem>>, vector<8x1xf32>
      %40 = tpu.reciprocal %39 {approx = true} : vector<8x1xf32> -> vector<8x1xf32>
      %41 = vector.broadcast %40 : vector<8x1xf32> to vector<8x8xf32>
      %42 = arith.mulf %38, %41 : vector<8x8xf32>
      %43 = arith.truncf %42 : vector<8x8xf32> to vector<8x8xbf16>
      %c0_31 = arith.constant 0 : index
      %c0_32 = arith.constant 0 : index
      %c0_33 = arith.constant 0 : index
      %44 = vector.load %arg6[%c0_31, %c0_32, %c0_33] : memref<1x8x8xbf16, #tpu.memory_space<vmem>>, vector<1x8x8xbf16>
      %45 = vector.shape_cast %44 : vector<1x8x8xbf16> to vector<8x8xbf16>
      %46 = vector.shape_cast %43 : vector<8x8xbf16> to vector<1x8x8xbf16>
      tpu.vector_store %arg6[%c0_31, %c0_32, %c0_33], %46 {strides = array<i32>} : memref<1x8x8xbf16, #tpu.memory_space<vmem>>, vector<1x8x8xbf16>,
    } else {
    }
    return
  }
  func.func @transform_0(%arg0: i32, %arg1: i32, %arg2: i32) -> (i32, i32, i32) {
    %c0_i32 = arith.constant 0 : i32
    %c0_i32_0 = arith.constant 0 : i32
    return %arg0, %arg1, %c0_i32 : i32, i32, i32
  }
  func.func @transform_1(%arg0: i32, %arg1: i32, %arg2: i32) -> (i32, i32, i32) {
    %c0_i32 = arith.constant 0 : i32
    %c0_i32_0 = arith.constant 0 : i32
    return %arg0, %c0_i32, %arg2 : i32, i32, i32
  }
  func.func @transform_2(%arg0: i32, %arg1: i32, %arg2: i32) -> (i32, i32, i32) {
    %c0_i32 = arith.constant 0 : i32
    %c0_i32_0 = arith.constant 0 : i32
    return %arg0, %c0_i32, %arg2 : i32, i32, i32
  }
  func.func @transform_3(%arg0: i32, %arg1: i32, %arg2: i32) -> (i32, i32, i32) {
    %c0_i32 = arith.constant 0 : i32
    %c0_i32_0 = arith.constant 0 : i32
    return %arg0, %arg1, %c0_i32 : i32, i32, i32
  }
}

module attributes {stable_mosaic.version = 11 : i64} {
  func.func @_matmul_kernel(%arg0: i32, %arg1: i32, %arg2: i32, %arg3: memref<16x32xbf16, #tpu.memory_space<vmem>>, %arg4: memref<32x16xbf16, #tpu.memory_space<vmem>>, %arg5: memref<1x16xf32, #tpu.memory_space<vmem>>, %arg6: memref<16x16xf32, #tpu.memory_space<vmem>>, %arg7: memref<16x16xf32, #tpu.memory_space<vmem>>) attributes {dimension_semantics = [#tpu.dimension_semantics<parallel>, #tpu.dimension_semantics<parallel>, #tpu.dimension_semantics<arbitrary>], iteration_bounds = array<i64: 1, 1, 1>, scalar_prefetch = 0 : i64, scratch_operands = 1 : i64, tpu.core_type = #tpu.core_type<tc>, window_params = [{transform_indices = @transform_0, window_bounds = array<i64: 16, 32>}, {transform_indices = @transform_1, window_bounds = array<i64: 32, 16>}, {transform_indices = @transform_2, window_bounds = array<i64: 1, 16>}, {transform_indices = @transform_3, window_bounds = array<i64: 16, 16>}]} {
    %c0_i32 = arith.constant 0 : i32
    %0 = arith.cmpi eq, %arg2, %c0_i32 : i32
    %1 = arith.extui %0 : i1 to i32
    %c0_i32_0 = arith.constant 0 : i32
    %2 = arith.cmpi ne, %1, %c0_i32_0 : i32
    scf.if %2 {
      %cst_10 = arith.constant 0.000000e+00 : f32
      %12 = vector.broadcast %cst_10 : f32 to vector<16x16xf32>
      %c0_11 = arith.constant 0 : index
      %c0_12 = arith.constant 0 : index
      %13 = vector.load %arg7[%c0_11, %c0_12] : memref<16x16xf32, #tpu.memory_space<vmem>>, vector<16x16xf32>
      tpu.vector_store %arg7[%c0_11, %c0_12], %12 {strides = array<i32>} : memref<16x16xf32, #tpu.memory_space<vmem>>, vector<16x16xf32>,
    } else {
    }
    %c0 = arith.constant 0 : index
    %c0_1 = arith.constant 0 : index
    %3 = vector.load %arg7[%c0, %c0_1] : memref<16x16xf32, #tpu.memory_space<vmem>>, vector<16x16xf32>
    %c0_2 = arith.constant 0 : index
    %c0_3 = arith.constant 0 : index
    %4 = vector.load %arg3[%c0_2, %c0_3] : memref<16x32xbf16, #tpu.memory_space<vmem>>, vector<16x32xbf16>
    %c0_4 = arith.constant 0 : index
    %c0_5 = arith.constant 0 : index
    %5 = vector.load %arg4[%c0_4, %c0_5] : memref<32x16xbf16, #tpu.memory_space<vmem>>, vector<32x16xbf16>
    %cst = arith.constant dense<0.000000e+00> : vector<16x16xf32>
    %6 = tpu.matmul %4, %5, %cst {dimension_numbers = #tpu.dot_dimension_numbers<[1], [0], [0], [1], [0, 0, 1, 1], [], []>} : vector<16x32xbf16>, vector<32x16xbf16>, vector<16x16xf32> -> vector<16x16xf32>
    %7 = arith.addf %3, %6 : vector<16x16xf32>
    %c0_6 = arith.constant 0 : index
    %c0_7 = arith.constant 0 : index
    %8 = vector.load %arg7[%c0_6, %c0_7] : memref<16x16xf32, #tpu.memory_space<vmem>>, vector<16x16xf32>
    tpu.vector_store %arg7[%c0_6, %c0_7], %7 {strides = array<i32>} : memref<16x16xf32, #tpu.memory_space<vmem>>, vector<16x16xf32>,
    %c0_i32_8 = arith.constant 0 : i32
    %9 = arith.cmpi eq, %arg2, %c0_i32_8 : i32
    %10 = arith.extui %9 : i1 to i32
    %c0_i32_9 = arith.constant 0 : i32
    %11 = arith.cmpi ne, %10, %c0_i32_9 : i32
    scf.if %11 {
      %c0_10 = arith.constant 0 : index
      %c0_11 = arith.constant 0 : index
      %12 = vector.load %arg7[%c0_10, %c0_11] : memref<16x16xf32, #tpu.memory_space<vmem>>, vector<16x16xf32>
      %c0_12 = arith.constant 0 : index
      %c0_13 = arith.constant 0 : index
      %13 = vector.load %arg5[%c0_12, %c0_13] : memref<1x16xf32, #tpu.memory_space<vmem>>, vector<1x16xf32>
      %14 = vector.broadcast %13 : vector<1x16xf32> to vector<16x16xf32>
      %15 = arith.addf %12, %14 : vector<16x16xf32>
      %c0_14 = arith.constant 0 : index
      %c0_15 = arith.constant 0 : index
      %16 = vector.load %arg6[%c0_14, %c0_15] : memref<16x16xf32, #tpu.memory_space<vmem>>, vector<16x16xf32>
      tpu.vector_store %arg6[%c0_14, %c0_15], %15 {strides = array<i32>} : memref<16x16xf32, #tpu.memory_space<vmem>>, vector<16x16xf32>,
    } else {
    }
    return
  }
  func.func @transform_0(%arg0: i32, %arg1: i32, %arg2: i32) -> (i32, i32) {
    %c0_i32 = arith.constant 0 : i32
    return %arg0, %arg2 : i32, i32
  }
  func.func @transform_1(%arg0: i32, %arg1: i32, %arg2: i32) -> (i32, i32) {
    %c0_i32 = arith.constant 0 : i32
    return %arg2, %arg1 : i32, i32
  }
  func.func @transform_2(%arg0: i32, %arg1: i32, %arg2: i32) -> (i32, i32) {
    %c0_i32 = arith.constant 0 : i32
    %c0_i32_0 = arith.constant 0 : i32
    return %c0_i32, %arg1 : i32, i32
  }
  func.func @transform_3(%arg0: i32, %arg1: i32, %arg2: i32) -> (i32, i32) {
    %c0_i32 = arith.constant 0 : i32
    return %arg0, %arg1 : i32, i32
  }
}

module attributes {stable_mosaic.version = 11 : i64} {
  func.func @_ffn_add_ln_kernel(%arg0: i32, %arg1: memref<16x32xf32, #tpu.memory_space<vmem>>, %arg2: memref<32x64xbf16, #tpu.memory_space<vmem>>, %arg3: memref<1x64xf32, #tpu.memory_space<vmem>>, %arg4: memref<64x32xbf16, #tpu.memory_space<vmem>>, %arg5: memref<1x32xf32, #tpu.memory_space<vmem>>, %arg6: memref<1x32xf32, #tpu.memory_space<vmem>>, %arg7: memref<1x32xf32, #tpu.memory_space<vmem>>, %arg8: memref<16x32xf32, #tpu.memory_space<vmem>>) attributes {dimension_semantics = [#tpu.dimension_semantics<parallel>], iteration_bounds = array<i64: 1>, scalar_prefetch = 0 : i64, scratch_operands = 0 : i64, tpu.core_type = #tpu.core_type<tc>, window_params = [{transform_indices = @transform_0, window_bounds = array<i64: 16, 32>}, {pipeline_mode = #tpu.pipeline_mode<synchronous>, transform_indices = @transform_1, window_bounds = array<i64: 32, 64>}, {pipeline_mode = #tpu.pipeline_mode<synchronous>, transform_indices = @transform_2, window_bounds = array<i64: 1, 64>}, {pipeline_mode = #tpu.pipeline_mode<synchronous>, transform_indices = @transform_3, window_bounds = array<i64: 64, 32>}, {pipeline_mode = #tpu.pipeline_mode<synchronous>, transform_indices = @transform_4, window_bounds = array<i64: 1, 32>}, {pipeline_mode = #tpu.pipeline_mode<synchronous>, transform_indices = @transform_5, window_bounds = array<i64: 1, 32>}, {pipeline_mode = #tpu.pipeline_mode<synchronous>, transform_indices = @transform_6, window_bounds = array<i64: 1, 32>}, {transform_indices = @transform_7, window_bounds = array<i64: 16, 32>}]} {
    %c0 = arith.constant 0 : index
    %c0_0 = arith.constant 0 : index
    %0 = vector.load %arg1[%c0, %c0_0] : memref<16x32xf32, #tpu.memory_space<vmem>>, vector<16x32xf32>
    %1 = arith.truncf %0 : vector<16x32xf32> to vector<16x32xbf16>
    %c0_1 = arith.constant 0 : index
    %c0_2 = arith.constant 0 : index
    %2 = vector.load %arg2[%c0_1, %c0_2] : memref<32x64xbf16, #tpu.memory_space<vmem>>, vector<32x64xbf16>
    %cst = arith.constant dense<0.000000e+00> : vector<16x64xf32>
    %3 = tpu.matmul %1, %2, %cst {dimension_numbers = #tpu.dot_dimension_numbers<[1], [0], [0], [1], [0, 0, 1, 1], [], []>} : vector<16x32xbf16>, vector<32x64xbf16>, vector<16x64xf32> -> vector<16x64xf32>
    %c0_3 = arith.constant 0 : index
    %c0_4 = arith.constant 0 : index
    %4 = vector.load %arg3[%c0_3, %c0_4] : memref<1x64xf32, #tpu.memory_space<vmem>>, vector<1x64xf32>
    %5 = vector.broadcast %4 : vector<1x64xf32> to vector<16x64xf32>
    %6 = arith.addf %3, %5 : vector<16x64xf32>
    %cst_5 = arith.constant 0.000000e+00 : f32
    %7 = vector.broadcast %cst_5 : f32 to vector<16x64xf32>
    %8 = arith.maximumf %6, %7 : vector<16x64xf32>
    %9 = arith.truncf %8 : vector<16x64xf32> to vector<16x64xbf16>
    %c0_6 = arith.constant 0 : index
    %c0_7 = arith.constant 0 : index
    %10 = vector.load %arg4[%c0_6, %c0_7] : memref<64x32xbf16, #tpu.memory_space<vmem>>, vector<64x32xbf16>
    %cst_8 = arith.constant dense<0.000000e+00> : vector<16x32xf32>
    %11 = tpu.matmul %9, %10, %cst_8 {dimension_numbers = #tpu.dot_dimension_numbers<[1], [0], [0], [1], [0, 0, 1, 1], [], []>} : vector<16x64xbf16>, vector<64x32xbf16>, vector<16x32xf32> -> vector<16x32xf32>
    %c0_9 = arith.constant 0 : index
    %c0_10 = arith.constant 0 : index
    %12 = vector.load %arg5[%c0_9, %c0_10] : memref<1x32xf32, #tpu.memory_space<vmem>>, vector<1x32xf32>
    %13 = vector.broadcast %12 : vector<1x32xf32> to vector<16x32xf32>
    %14 = arith.addf %11, %13 : vector<16x32xf32>
    %15 = arith.addf %14, %0 : vector<16x32xf32>
    %cst_11 = arith.constant dense<0.000000e+00> : vector<16xf32>
    %16 = vector.multi_reduction <add>, %15, %cst_11 [1] : vector<16x32xf32> to vector<16xf32>
    %17 = vector.shape_cast %16 : vector<16xf32> to vector<16x1xf32>
    %cst_12 = arith.constant 3.200000e+01 : f32
    %18 = vector.broadcast %cst_12 : f32 to vector<16x1xf32>
    %19 = arith.divf %17, %18 : vector<16x1xf32>
    %20 = vector.broadcast %19 : vector<16x1xf32> to vector<16x32xf32>
    %21 = arith.subf %15, %20 : vector<16x32xf32>
    %22 = vector.broadcast %19 : vector<16x1xf32> to vector<16x32xf32>
    %23 = arith.subf %15, %22 : vector<16x32xf32>
    %24 = arith.mulf %21, %23 : vector<16x32xf32>
    %cst_13 = arith.constant dense<0.000000e+00> : vector<16xf32>
    %25 = vector.multi_reduction <add>, %24, %cst_13 [1] : vector<16x32xf32> to vector<16xf32>
    %26 = vector.shape_cast %25 : vector<16xf32> to vector<16x1xf32>
    %cst_14 = arith.constant 3.200000e+01 : f32
    %27 = vector.broadcast %cst_14 : f32 to vector<16x1xf32>
    %28 = arith.divf %26, %27 : vector<16x1xf32>
    %29 = vector.broadcast %19 : vector<16x1xf32> to vector<16x32xf32>
    %30 = arith.subf %15, %29 : vector<16x32xf32>
    %cst_15 = arith.constant 9.99999974E-6 : f32
    %31 = vector.broadcast %cst_15 : f32 to vector<16x1xf32>
    %32 = arith.addf %28, %31 : vector<16x1xf32>
    %33 = math.rsqrt %32 : vector<16x1xf32>
    %34 = vector.broadcast %33 : vector<16x1xf32> to vector<16x32xf32>
    %35 = arith.mulf %30, %34 : vector<16x32xf32>
    %c0_16 = arith.constant 0 : index
    %c0_17 = arith.constant 0 : index
    %36 = vector.load %arg6[%c0_16, %c0_17] : memref<1x32xf32, #tpu.memory_space<vmem>>, vector<1x32xf32>
    %37 = vector.broadcast %36 : vector<1x32xf32> to vector<16x32xf32>
    %38 = arith.mulf %35, %37 : vector<16x32xf32>
    %c0_18 = arith.constant 0 : index
    %c0_19 = arith.constant 0 : index
    %39 = vector.load %arg7[%c0_18, %c0_19] : memref<1x32xf32, #tpu.memory_space<vmem>>, vector<1x32xf32>
    %40 = vector.broadcast %39 : vector<1x32xf32> to vector<16x32xf32>
    %41 = arith.addf %38, %40 : vector<16x32xf32>
    %c0_20 = arith.constant 0 : index
    %c0_21 = arith.constant 0 : index
    %42 = vector.load %arg8[%c0_20, %c0_21] : memref<16x32xf32, #tpu.memory_space<vmem>>, vector<16x32xf32>
    tpu.vector_store %arg8[%c0_20, %c0_21], %41 {strides = array<i32>} : memref<16x32xf32, #tpu.memory_space<vmem>>, vector<16x32xf32>,
    return
  }
  func.func @transform_0(%arg0: i32) -> (i32, i32) {
    %c0_i32 = arith.constant 0 : i32
    %c0_i32_0 = arith.constant 0 : i32
    return %arg0, %c0_i32 : i32, i32
  }
  func.func @transform_1(%arg0: i32) -> (i32, i32) {
    %c0_i32 = arith.constant 0 : i32
    %c0_i32_0 = arith.constant 0 : i32
    %c0_i32_1 = arith.constant 0 : i32
    return %c0_i32, %c0_i32_0 : i32, i32
  }
  func.func @transform_2(%arg0: i32) -> (i32, i32) {
    %c0_i32 = arith.constant 0 : i32
    %c0_i32_0 = arith.constant 0 : i32
    %c0_i32_1 = arith.constant 0 : i32
    return %c0_i32, %c0_i32_0 : i32, i32
  }
  func.func @transform_3(%arg0: i32) -> (i32, i32) {
    %c0_i32 = arith.constant 0 : i32
    %c0_i32_0 = arith.constant 0 : i32
    %c0_i32_1 = arith.constant 0 : i32
    return %c0_i32, %c0_i32_0 : i32, i32
  }
  func.func @transform_4(%arg0: i32) -> (i32, i32) {
    %c0_i32 = arith.constant 0 : i32
    %c0_i32_0 = arith.constant 0 : i32
    %c0_i32_1 = arith.constant 0 : i32
    return %c0_i32, %c0_i32_0 : i32, i32
  }
  func.func @transform_5(%arg0: i32) -> (i32, i32) {
    %c0_i32 = arith.constant 0 : i32
    %c0_i32_0 = arith.constant 0 : i32
    %c0_i32_1 = arith.constant 0 : i32
    return %c0_i32, %c0_i32_0 : i32, i32
  }
  func.func @transform_6(%arg0: i32) -> (i32, i32) {
    %c0_i32 = arith.constant 0 : i32
    %c0_i32_0 = arith.constant 0 : i32
    %c0_i32_1 = arith.constant 0 : i32
    return %c0_i32, %c0_i32_0 : i32, i32
  }
  func.func @transform_7(%arg0: i32) -> (i32, i32) {
    %c0_i32 = arith.constant 0 : i32
    %c0_i32_0 = arith.constant 0 : i32
    return %arg0, %c0_i32 : i32, i32
  }
}

</mosaic_0001>

<bundles_post_ra>
// kernel: decoder_forward.18
= control target key start
LH: loop header
LB: loop body
LE: loop exit
PB: predicated region body
PF: predicated region fallthrough
CT: control target
= control target key end

     0   :  { %s650_s12 = smov 0   ;;  %s652_s13 = smov 0   ;;  %s706_s0 = inlined_call_operand.vmem [shape: bf16[8,8,8], index: 0, kind: input, shape index: {}]   ;;  %s707_s1 = inlined_call_operand.vmem [shape: bf16[8,8,8], index: 1, kind: input, shape index: {}]   ;;  %s708_s2 = inlined_call_operand.vmem [shape: bf16[8,8,8], index: 2, kind: input, shape index: {}]   ;;  %s709_s3 = inlined_call_operand.vmem [shape: bf16[8,8,8], index: 3, kind: output, shape index: {}]  }
   0x1   :  { %s654_s14 = smov 0  }
   0x2 LB: > { %s32_s15 = sadd.s32 1, %s620_s13  ;;  %p541_p0 = scmp.ge.s32.totalorder %s624_s14, 1  ;;  %s624_s14 = sphi %s654_s14, %s13_s14   ;;  %s620_s13 = sphi %s652_s13, %s711_s13   ;;  %s616_s12 = sphi %s650_s12, %s710_s12  }
   0x3   : > { %p34_p1 = scmp.ge.s32.totalorder %s32_s15, 8  ;;  %p190_p2 = scmp.lt.s32.totalorder %s624_s14, 9 }
   0x5   : > { %s713_s15 = smov (%p34_p1, %s32_s15), 0  ;;  %p191_p3 = pnand %p541_p0, %p190_p2 }
   0x6   : > { %p232_p4 = scmp.lt.s32.totalorder (!%p191_p3), %s616_s12, 7  ;;  %vm268_vm0 = vcmask (!%p191_p3), 64512   ;;  %v626_v0 = vmov (!%p191_p3), 0.0   ;;  %vm627_vm1 = vmmov (!%p191_p3), 0   ;;  %vm265_vm2 = vcmask (!%p191_p3), 7168  }
   0x7   : > { %194 = sbr.rel (%p191_p3) target bundleno = 826 (0x33a), region = 32  ;;  %554 = vmatprep.subr.bf16.mxu0 (!%p191_p3), %v626_v0  ;;  %269 = vst.msk [vmem:[#allocation4] sm:$0xff] (!%p191_p3), %vm268_vm0, %v626_v0  ;;  %556 = vmatprep.mubr.msk.bf16.mxu0 (!%p191_p3), %vm627_vm1, %v626_v0  ;;  %v628_v4 = vmov (!%p191_p3), -inf   ;;  %v322_v5 = vlaneseq (!%p191_p3)  ;;  %v629_v15 = vmov (!%p191_p3), 0   ;;  %vm368_vm4 = vcmask (!%p191_p3), 1043456  }
   0x8   : > { %560 = vmatprep.subr.bf16.mxu1 (!%p191_p3), %v626_v0  ;;  %562 = vmatprep.mubr.msk.bf16.mxu1 (!%p191_p3), %vm627_vm1, %v626_v0  ;;  %266 = vst.msk [vmem:[#allocation2] sm:$0xff] (!%p191_p3), %vm265_vm2, %v628_v4  ;;  %267 = vst.msk [vmem:[#allocation3] sm:$0xff] (!%p191_p3), %vm265_vm2, %v626_v0  ;;  %vm428_vm5 = vcmask (!%p191_p3), 60416  }
   0x9   : > { %v323_v6 = vshrl.u32 (!%p191_p3), %v322_v5, 7  ;;  %v328_v7 = vand.u32 (!%p191_p3), 127, %v322_v5  ;;  %594 = vset.pattern.permute.xlu0 (!%p191_p3), %v629_v15  ;;  %595 = vset.pattern.permute.xlu1 (!%p191_p3), %v629_v15 }
   0xb   : > { %vm331_vm3 = vcmp.ge.s32.totalorder (!%p191_p3), %v323_v6, %v328_v7 }
   0xe   : > { %s715_s12 = smov (!%p232_p4, %s616_s12), 7  ;;  %v357_v36 = vld [vmem:[#allocation4] sm:$0xff] }
   0xf   : > { %s669_s16 = sshll.u32 %s715_s12, 2  ;;  %v333_v16 = vld [vmem:[#allocation2] sm:$0xff]  ;;  %v349_v30 = vld [vmem:[#allocation3] sm:$0xff] }
  0x10   : > { %s245_s19 = scalar_lea.vmem %s707_s1, %s669_s16  ;;  %s238_s22 = scalar_lea.vmem %s706_s0, %s669_s16 }
  0x11   : > { %v271_v1 = vld [vmem:[%s245_s19] sm:$0xf]  ;;  %s252_s25 = scalar_lea.vmem %s708_s2, %s669_s16  ;;  %s259_s28 = scalar_lea.vmem %s709_s3, %s669_s16 }
  0x12   : > { %v278_v2 = vsel %vm268_vm0, %v271_v1, 0  ;;  %v270_v3 = vld [vmem:[%s238_s22] sm:$0xf] }
  0x13   : > { %555 = vmatpush3.bf16.xpose.msra.mxu0 %v278_v2  ;;  %v272_v20 = vld [vmem:[%s252_s25] sm:$0xf] }
  0x14   : > { %v370_v21 = vsel %vm368_vm4, %v272_v20, 0 }
  0x15   : > { %561 = vmatpush3.bf16.msra.mxu1 %v370_v21 }
  0x1a   : > { %557 = vmatmul.mubr.msk.bf16.vlgmr.msra.gmra.mrb[0].mxu0 %vm268_vm0, %v270_v3 }
  0xed   : > { %v314_v8 = vpop.f32.mrb[0].mxu0 }
  0xee   : > { %v320_v9 = vmul.f32 0.17677669, %v314_v8  ;;  %v558_v10 = vpop.f32.mrb[1].mxu0 }
  0xef   : > { %v317_v11 = vpop.f32.mrb[2].mxu0 }
  0xf0   : > { %v559_v12 = vpop.f32.mrb[3].mxu0  ;;  %v332_v13 = vsel %vm331_vm3, %v320_v9, -1e+20 }
  0xf1   : > { %v334_v14 = vsel %vm268_vm0, %v332_v13, -inf }
  0xf2   : > { %335 = vmax.xlane.f32.xlu0 %v334_v14 }
 0x17f   : > { %v336_v17 = vpop.xlane.xlu0 %335 }
 0x180   : > { %v337_v18 = vmax.f32 %v333_v16, %v336_v17 }
 0x182   : > { %v338_v19 = vsub.f32 %v333_v16, %v337_v18  ;;  %414 = vst.msk [vmem:[#allocation2] sm:$0xff] %vm265_vm2, %v337_v18  ;;  %343 = vperm.xlu0 %594, %v337_v18  }
 0x184   : > { %v339_v28 = vmul.f32 1.442695, %v338_v19 }
 0x201   : > { %v344_v22 = vpop.permute.xlu0 %343 }
 0x202   : > { %v346_v23 = vsub.f32 %v332_v13, %v344_v22 }
 0x204   : > { %v347_v24 = vmul.f32 1.442695, %v346_v23 }
 0x206   : > { %596 = vpow2.f32 %v347_v24 }
 0x207   : > { %598 = vpow2.f32 %v339_v28 }
 0x210   : > { %v597_v25 = vpop.eup %596 }
 0x211   : > { %v351_v26 = vsel %vm268_vm0, %v597_v25, 0.0  ;;  %v364_v27 = vpack.c.bf16 %v597_v25, %v597_v25  ;;  %v599_v29 = vpop.eup %598 }
 0x212   : > { %352 = vadd.xlane.f32.xlu1 %v351_v26  ;;  %v350_v31 = vmul.f32 %v599_v29, %v349_v30 }
 0x213   : > { %563 = vmatmul.mubr.msk.bf16.vlgmr.msra.gmra.mrb[0].mxu1 %vm268_vm0, %v364_v27 }
 0x223   : > { %360 = vperm.xlu1 %595, %v599_v29  }
 0x29f   : > { %v353_v32 = vpop.xlane.xlu1 %352 }
 0x2a0   : > { %v354_v33 = vadd.f32 %v353_v32, %v350_v31 }
 0x2a2   : > { %356 = vst.msk [vmem:[#allocation3] sm:$0xff] %vm265_vm2, %v354_v33 }
 0x2a3   : > { %v361_v37 = vpop.permute.xlu1 %360 }
 0x2a4   : > { %v363_v38 = vmul.f32 %v361_v37, %v357_v36 }
 0x2a9   : > { %v419_v34 = vld [vmem:[#allocation3] sm:$0xff] }
 0x2aa   : > { %600 = vrcp.f32 %v419_v34 }
 0x2b4   : > { %v601_v35 = vpop.eup %600 }
 0x2b5   : > { %423 = vperm.xlu1 %595, %v601_v35  }
 0x2e6   : > { %v406_v39 = vpop.f32.mrb[0].mxu1 }
 0x2e7   : > { %v412_v40 = vadd.f32 %v406_v39, %v363_v38  ;;  %v564_v41 = vpop.f32.mrb[1].mxu1 }
 0x2e8   : > { %v409_v42 = vpop.f32.mrb[2].mxu1 }
 0x2e9   : > { %413 = vst.msk [vmem:[#allocation4] sm:$0xff] %vm268_vm0, %v412_v40  ;;  %v565_v43 = vpop.f32.mrb[3].mxu1 }
 0x2f0   : > { %v418_v44 = vld [vmem:[#allocation4] sm:$0xff] }
 0x334   : > { %v424_v45 = vpop.permute.xlu1 %423 }
 0x335   : > { %v426_v46 = vmul.f32 %v424_v45, %v418_v44 }
 0x337   : > { %v427_v47 = vpack.c.bf16 %v426_v46, %v426_v46 }
 0x339   : > { %429 = vst.msk [vmem:[%s259_s28] sm:$0xf] %vm428_vm5, %v427_v47 }
 0x33a PF: > { %s13_s14 = sadd.s32 1, %s624_s14   ;;  %s710_s12 = smov %s620_s13 }
 0x33b   : > { %p10_p5 = scmp.ge.s32.totalorder %s13_s14, 10   ;;  %s711_s13 = smov %s713_s15 }
 0x33d   :  { %12 = sbr.rel (!%p10_p5) target bundleno = 2 (0x2), region = 76 }

// kernel: decoder_forward.17
= control target key start
LH: loop header
LB: loop body
LE: loop exit
PB: predicated region body
PF: predicated region fallthrough
CT: control target
= control target key end

     0   :  { %vm19_vm0 = vcmask 785408   ;;  %v151_v0 = vmov 0.0   ;;  %vm152_vm1 = vmmov 0   ;;  %vm47_vm2 = vcmask 261120   ;;  %s195_s1 = inlined_call_operand.vmem [shape: bf16[32,96], index: 1, kind: input, shape index: {}]   ;;  %s196_s0 = inlined_call_operand.vmem [shape: bf16[16,32], index: 0, kind: input, shape index: {}]   ;;  %s197_s2 = inlined_call_operand.vmem [shape: f32[1,96], index: 2, kind: input, shape index: {}]   ;;  %s198_s3 = inlined_call_operand.vmem [shape: bf16[16,96], index: 3, kind: output, shape index: {}]  }
   0x1   :  { %138 = vmatprep.subr.bf16.mxu0 %v151_v0  ;;  %v148_v1 = vld [vmem:[%s195_s1] sm:$0xff]   ;;  %142 = vmatprep.mubr.msk.bf16.mxu0 %vm152_vm1, %v151_v0  ;;  %20 = vst.msk [vmem:[#allocation2] sm:$0xff] %vm19_vm0, %v151_v0  ;;  %21 = vst.msk [vmem:[#allocation2 + $0x8] sm:$0xff] %vm19_vm0, %v151_v0  ;;  %v149_v2 = vld [vmem:[%s195_s1 + $0x8] sm:$0xff]   ;;  %vm119_vm3 = vcmask 781312  }
   0x2   :  { %139 = vmatpush3.bf16.msra.mxu0 %v148_v1  ;;  %v150_v3 = vld [vmem:[%s196_s0] sm:$0xff]  }
   0x3   :  { %140 = vmatprep.subr.bf16.mxu0 %v151_v0  ;;  %v130_v12 = vld [vmem:[%s197_s2] ss:$0 sm:$0xff] }
   0x6   :  { %141 = vmatpush3.bf16.msra.mxu0 %v149_v2 }
   0x8   :  { %v22_v4 = vld [vmem:[#allocation2] sm:$0xff]  ;;  %v23_v6 = vld [vmem:[#allocation2 + $0x8] sm:$0xff] }
   0x9   :  { %143 = vmatmul.mubr.msk.bf16.vlgmr.msra.gmra.mrb[0].mxu0 %vm47_vm2, %v150_v3 }
  0xdc   :  { %v85_v5 = vpop.f32.mrb[0].mxu0 }
  0xdd   :  { %v92_v7 = vadd.f32 %v85_v5, %v22_v4  ;;  %v144_v8 = vpop.f32.mrb[1].mxu0 }
  0xde   :  { %v88_v9 = vpop.f32.mrb[2].mxu0 }
  0xdf   :  { %95 = vst.msk [vmem:[#allocation2] sm:$0xff] %vm19_vm0, %v92_v7  ;;  %v93_v10 = vadd.f32 %v88_v9, %v23_v6  ;;  %v145_v11 = vpop.f32.mrb[3].mxu0 }
  0xe1   :  { %96 = vst.msk [vmem:[#allocation2 + $0x8] sm:$0xff] %vm19_vm0, %v93_v10 }
  0xe6   :  { %v100_v13 = vld [vmem:[#allocation2] sm:$0xff] }
  0xe7   :  { %v109_v14 = vadd.f32 %v130_v12, %v100_v13 }
  0xe8   :  { %v101_v15 = vld [vmem:[#allocation2 + $0x8] sm:$0xff] }
  0xe9   :  { %v133_v16 = vpack.c.bf16 %v109_v14, %v109_v14  ;;  %v110_v17 = vadd.f32 %v130_v12, %v101_v15 }
  0xeb   :  { %120 = vst.msk [vmem:[%s198_s3] sm:$0xf] %vm119_vm3, %v133_v16  ;;  %v134_v18 = vpack.c.bf16 %v110_v17, %v110_v17 }
  0xed   :  { %121 = vst.msk [vmem:[%s198_s3 + $0x4] sm:$0xf] %vm119_vm3, %v134_v18 }

// kernel: decoder_forward.19
= control target key start
LH: loop header
LB: loop body
LE: loop exit
PB: predicated region body
PF: predicated region fallthrough
CT: control target
= control target key end

     0   :  { %v181_v0 = vmov 0.0   ;;  %vm182_vm0 = vmmov 0   ;;  %vm54_vm1 = vcmask 261120   ;;  %s255_s1 = inlined_call_operand.vmem [shape: bf16[32,32], index: 1, kind: input, shape index: {}]   ;;  %s256_s0 = inlined_call_operand.vmem [shape: bf16[16,32], index: 0, kind: input, shape index: {}]   ;;  %s257_s2 = inlined_call_operand.vmem [shape: f32[1,32], index: 2, kind: input, shape index: {}]   ;;  %s258_s3 = inlined_call_operand.vmem [shape: f32[16,32], index: 3, kind: input, shape index: {}]   ;;  %s259_s4 = inlined_call_operand.vmem [shape: f32[1,32], index: 4, kind: input, shape index: {}]   ;;  %s260_s5 = inlined_call_operand.vmem [shape: f32[1,32], index: 5, kind: input, shape index: {}]   ;;  %s261_s6 = inlined_call_operand.vmem [shape: f32[16,32], index: 6, kind: output, shape index: {}]  }
   0x1   :  { %164 = vmatprep.subr.bf16.mxu0 %v181_v0  ;;  %v174_v1 = vld [vmem:[%s255_s1] sm:$0xff]   ;;  %168 = vmatprep.mubr.msk.bf16.mxu0 %vm182_vm0, %v181_v0  ;;  %v175_v2 = vld [vmem:[%s255_s1 + $0x8] sm:$0xff]  }
   0x2   :  { %165 = vmatpush3.bf16.msra.mxu0 %v174_v1  ;;  %v176_v3 = vld [vmem:[%s256_s0] sm:$0xff]   ;;  %v100_v10 = vld [vmem:[%s258_s3 + $0x8] sm:$0xff] }
   0x3   :  { %166 = vmatprep.subr.bf16.mxu0 %v181_v0  ;;  %v154_v4 = vld [vmem:[%s257_s2] ss:$0 sm:$0xff] }
   0x4   :  { %v99_v6 = vld [vmem:[%s258_s3] sm:$0xff] }
   0x5   :  { %v159_v34 = vld [vmem:[%s259_s4] ss:$0 sm:$0xff] }
   0x6   :  { %167 = vmatpush3.bf16.msra.mxu0 %v175_v2  ;;  %v160_v36 = vld [vmem:[%s260_s5] ss:$0 sm:$0xff] }
   0x9   :  { %169 = vmatmul.mubr.msk.bf16.vlgmr.msra.gmra.mrb[0].mxu0 %vm54_vm1, %v176_v3 }
  0xdc   :  { %v92_v5 = vpop.f32.mrb[0].mxu0 }
  0xdd   :  { %v93_v7 = vadd.f32 %v154_v4, %v92_v5  ;;  %v170_v8 = vpop.f32.mrb[1].mxu0 }
  0xde   :  { %v95_v9 = vpop.f32.mrb[2].mxu0 }
  0xdf   :  { %v96_v11 = vadd.f32 %v154_v4, %v95_v9  ;;  %v171_v12 = vpop.f32.mrb[3].mxu0  ;;  %v101_v13 = vadd.f32 %v99_v6, %v93_v7 }
  0xe1   :  { %v103_v14 = vsel %vm54_vm1, %v101_v13, 0.0  ;;  %v102_v15 = vadd.f32 %v100_v10, %v96_v11 }
  0xe2   :  { %104 = vadd.xlane.f32.xlu0 %v103_v14 }
  0xe3   :  { %v106_v16 = vsel %vm54_vm1, %v102_v15, 0.0 }
  0xe6   :  { %107 = vadd.xlane.f32.xlu0 %v106_v16 }
 0x16f   :  { %v105_v17 = vpop.xlane.xlu0 %104 }
 0x170   :  { %v110_v18 = vmul.f32 0.03125, %v105_v17 }
 0x172   :  { %v112_v19 = vsub.f32 %v101_v13, %v110_v18 }
 0x173   :  { %v108_v20 = vpop.xlane.xlu0 %107 }
 0x174   :  { %v111_v21 = vmul.f32 0.03125, %v108_v20  ;;  %v114_v22 = vmul.f32 %v112_v19, %v112_v19 }
 0x176   :  { %v113_v23 = vsub.f32 %v102_v15, %v111_v21  ;;  %v116_v24 = vsel %vm54_vm1, %v114_v22, 0.0 }
 0x177   :  { %117 = vadd.xlane.f32.xlu1 %v116_v24 }
 0x178   :  { %v115_v25 = vmul.f32 %v113_v23, %v113_v23 }
 0x17a   :  { %v119_v26 = vsel %vm54_vm1, %v115_v25, 0.0 }
 0x17b   :  { %120 = vadd.xlane.f32.xlu1 %v119_v26 }
 0x204   :  { %v118_v27 = vpop.xlane.xlu1 %117 }
 0x205   :  { %v122_v28 = vmul.f32 0.03125, %v118_v27 }
 0x207   :  { %v124_v29 = vadd.f32 1e-05, %v122_v28 }
 0x208   :  { %v121_v30 = vpop.xlane.xlu1 %120 }
 0x209   :  { %177 = vrsqrt.f32 %v124_v29  ;;  %v123_v31 = vmul.f32 0.03125, %v121_v30 }
 0x20b   :  { %v125_v32 = vadd.f32 1e-05, %v123_v31 }
 0x20d   :  { %179 = vrsqrt.f32 %v125_v32 }
 0x213   :  { %v178_v33 = vpop.eup %177 }
 0x214   :  { %v128_v35 = vmul.f32 %v178_v33, %v112_v19 }
 0x216   :  { %v137_v37 = vmul.f32 %v159_v34, %v128_v35 }
 0x217   :  { %v180_v38 = vpop.eup %179 }
 0x218   :  { %v146_v39 = vadd.f32 %v160_v36, %v137_v37  ;;  %v129_v40 = vmul.f32 %v180_v38, %v113_v23 }
 0x21a   :  { %148 = vst.msk [vmem:[%s261_s6] sm:$0xff] %vm54_vm1, %v146_v39  ;;  %v138_v41 = vmul.f32 %v159_v34, %v129_v40 }
 0x21c   :  { %v147_v42 = vadd.f32 %v160_v36, %v138_v41 }
 0x21e   :  { %149 = vst.msk [vmem:[%s261_s6 + $0x8] sm:$0xff] %vm54_vm1, %v147_v42 }

// kernel: decoder_forward.20
= control target key start
LH: loop header
LB: loop body
LE: loop exit
PB: predicated region body
PF: predicated region fallthrough
CT: control target
= control target key end

     0   :  { %vm19_vm0 = vcmask 261120   ;;  %v150_v0 = vmov 0.0   ;;  %vm151_vm1 = vmmov 0   ;;  %vm118_vm2 = vcmask 257024   ;;  %s195_s1 = inlined_call_operand.vmem [shape: bf16[32,32], index: 1, kind: input, shape index: {}]   ;;  %s196_s0 = inlined_call_operand.vmem [shape: bf16[16,32], index: 0, kind: input, shape index: {}]   ;;  %s197_s2 = inlined_call_operand.vmem [shape: f32[1,32], index: 2, kind: input, shape index: {}]   ;;  %s198_s3 = inlined_call_operand.vmem [shape: bf16[16,32], index: 3, kind: output, shape index: {}]  }
   0x1   :  { %137 = vmatprep.subr.bf16.mxu0 %v150_v0  ;;  %v147_v1 = vld [vmem:[%s195_s1] sm:$0xff]   ;;  %141 = vmatprep.mubr.msk.bf16.mxu0 %vm151_vm1, %v150_v0  ;;  %20 = vst.msk [vmem:[#allocation2] sm:$0xff] %vm19_vm0, %v150_v0  ;;  %21 = vst.msk [vmem:[#allocation2 + $0x8] sm:$0xff] %vm19_vm0, %v150_v0  ;;  %v148_v2 = vld [vmem:[%s195_s1 + $0x8] sm:$0xff]  }
   0x2   :  { %138 = vmatpush3.bf16.msra.mxu0 %v147_v1  ;;  %v149_v3 = vld [vmem:[%s196_s0] sm:$0xff]  }
   0x3   :  { %139 = vmatprep.subr.bf16.mxu0 %v150_v0  ;;  %v129_v12 = vld [vmem:[%s197_s2] ss:$0 sm:$0xff] }
   0x6   :  { %140 = vmatpush3.bf16.msra.mxu0 %v148_v2 }
   0x8   :  { %v22_v4 = vld [vmem:[#allocation2] sm:$0xff]  ;;  %v23_v6 = vld [vmem:[#allocation2 + $0x8] sm:$0xff] }
   0x9   :  { %142 = vmatmul.mubr.msk.bf16.vlgmr.msra.gmra.mrb[0].mxu0 %vm19_vm0, %v149_v3 }
  0xdc   :  { %v85_v5 = vpop.f32.mrb[0].mxu0 }
  0xdd   :  { %v92_v7 = vadd.f32 %v85_v5, %v22_v4  ;;  %v143_v8 = vpop.f32.mrb[1].mxu0 }
  0xde   :  { %v88_v9 = vpop.f32.mrb[2].mxu0 }
  0xdf   :  { %94 = vst.msk [vmem:[#allocation2] sm:$0xff] %vm19_vm0, %v92_v7  ;;  %v93_v10 = vadd.f32 %v88_v9, %v23_v6  ;;  %v144_v11 = vpop.f32.mrb[3].mxu0 }
  0xe1   :  { %95 = vst.msk [vmem:[#allocation2 + $0x8] sm:$0xff] %vm19_vm0, %v93_v10 }
  0xe6   :  { %v99_v13 = vld [vmem:[#allocation2] sm:$0xff] }
  0xe7   :  { %v108_v14 = vadd.f32 %v129_v12, %v99_v13 }
  0xe8   :  { %v100_v15 = vld [vmem:[#allocation2 + $0x8] sm:$0xff] }
  0xe9   :  { %v132_v16 = vpack.c.bf16 %v108_v14, %v108_v14  ;;  %v109_v17 = vadd.f32 %v129_v12, %v100_v15 }
  0xeb   :  { %119 = vst.msk [vmem:[%s198_s3] sm:$0xf] %vm118_vm2, %v132_v16  ;;  %v133_v18 = vpack.c.bf16 %v109_v17, %v109_v17 }
  0xed   :  { %120 = vst.msk [vmem:[%s198_s3 + $0x4] sm:$0xf] %vm118_vm2, %v133_v18 }

// kernel: decoder_forward.21
= control target key start
LH: loop header
LB: loop body
LE: loop exit
PB: predicated region body
PF: predicated region fallthrough
CT: control target
= control target key end

     0   :  { %vm19_vm0 = vcmask 523264   ;;  %v151_v0 = vmov 0.0   ;;  %vm152_vm1 = vmmov 0   ;;  %vm47_vm2 = vcmask 261120   ;;  %s195_s1 = inlined_call_operand.vmem [shape: bf16[32,64], index: 1, kind: input, shape index: {}]   ;;  %s196_s0 = inlined_call_operand.vmem [shape: bf16[16,32], index: 0, kind: input, shape index: {}]   ;;  %s197_s2 = inlined_call_operand.vmem [shape: f32[1,64], index: 2, kind: input, shape index: {}]   ;;  %s198_s3 = inlined_call_operand.vmem [shape: bf16[16,64], index: 3, kind: output, shape index: {}]  }
   0x1   :  { %138 = vmatprep.subr.bf16.mxu0 %v151_v0  ;;  %v148_v1 = vld [vmem:[%s195_s1] sm:$0xff]   ;;  %142 = vmatprep.mubr.msk.bf16.mxu0 %vm152_vm1, %v151_v0  ;;  %20 = vst.msk [vmem:[#allocation2] sm:$0xff] %vm19_vm0, %v151_v0  ;;  %21 = vst.msk [vmem:[#allocation2 + $0x8] sm:$0xff] %vm19_vm0, %v151_v0  ;;  %v149_v2 = vld [vmem:[%s195_s1 + $0x8] sm:$0xff]   ;;  %vm119_vm3 = vcmask 519168  }
   0x2   :  { %139 = vmatpush3.bf16.msra.mxu0 %v148_v1  ;;  %v150_v3 = vld [vmem:[%s196_s0] sm:$0xff]  }
   0x3   :  { %140 = vmatprep.subr.bf16.mxu0 %v151_v0  ;;  %v130_v12 = vld [vmem:[%s197_s2] ss:$0 sm:$0xff] }
   0x6   :  { %141 = vmatpush3.bf16.msra.mxu0 %v149_v2 }
   0x8   :  { %v22_v4 = vld [vmem:[#allocation2] sm:$0xff]  ;;  %v23_v6 = vld [vmem:[#allocation2 + $0x8] sm:$0xff] }
   0x9   :  { %143 = vmatmul.mubr.msk.bf16.vlgmr.msra.gmra.mrb[0].mxu0 %vm47_vm2, %v150_v3 }
  0xdc   :  { %v85_v5 = vpop.f32.mrb[0].mxu0 }
  0xdd   :  { %v92_v7 = vadd.f32 %v85_v5, %v22_v4  ;;  %v144_v8 = vpop.f32.mrb[1].mxu0 }
  0xde   :  { %v88_v9 = vpop.f32.mrb[2].mxu0 }
  0xdf   :  { %95 = vst.msk [vmem:[#allocation2] sm:$0xff] %vm19_vm0, %v92_v7  ;;  %v93_v10 = vadd.f32 %v88_v9, %v23_v6  ;;  %v145_v11 = vpop.f32.mrb[3].mxu0 }
  0xe1   :  { %96 = vst.msk [vmem:[#allocation2 + $0x8] sm:$0xff] %vm19_vm0, %v93_v10 }
  0xe6   :  { %v100_v13 = vld [vmem:[#allocation2] sm:$0xff] }
  0xe7   :  { %v109_v14 = vadd.f32 %v130_v12, %v100_v13 }
  0xe8   :  { %v101_v15 = vld [vmem:[#allocation2 + $0x8] sm:$0xff] }
  0xe9   :  { %v133_v16 = vpack.c.bf16 %v109_v14, %v109_v14  ;;  %v110_v17 = vadd.f32 %v130_v12, %v101_v15 }
  0xeb   :  { %120 = vst.msk [vmem:[%s198_s3] sm:$0xf] %vm119_vm3, %v133_v16  ;;  %v134_v18 = vpack.c.bf16 %v110_v17, %v110_v17 }
  0xed   :  { %121 = vst.msk [vmem:[%s198_s3 + $0x4] sm:$0xf] %vm119_vm3, %v134_v18 }

// kernel: decoder_forward.33
= control target key start
LH: loop header
LB: loop body
LE: loop exit
PB: predicated region body
PF: predicated region fallthrough
CT: control target
= control target key end

     0   :  { %v178_v1 = vmov 0.0   ;;  %vm179_vm0 = vmmov 0   ;;  %vm20_vm1 = vcmask 130048   ;;  %s233_s0 = inlined_call_operand.vmem [shape: bf16[16,32], index: 0, kind: input, shape index: {}]   ;;  %s234_s1 = inlined_call_operand.vmem [shape: bf16[32,16], index: 1, kind: input, shape index: {}]   ;;  %s235_s2 = inlined_call_operand.vmem [shape: f32[1,16], index: 2, kind: input, shape index: {}]   ;;  %s236_s3 = inlined_call_operand.hbm [shape: f32[16,16], index: 3, kind: output, shape index: {}]  }
   0x1   :  { %v151_v0 = vld [vmem:[%s234_s1] sm:$0xff]   ;;  %138 = vmatprep.subr.bf16.mxu0 %v178_v1  ;;  %v152_v2 = vld [vmem:[%s234_s1 + $0x8] sm:$0xff]   ;;  %142 = vmatprep.mubr.msk.bf16.mxu0 %vm179_vm0, %v178_v1 }
   0x2   :  { %139 = vmatpush3.bf16.msra.mxu0 %v151_v0 }
   0x3   :  { %140 = vmatprep.subr.bf16.mxu0 %v178_v1 }
   0x4   :  { %8 = vsyncpa [#allocation4], 0  ;;  %21 = vst.msk [vmem:[#allocation2] sm:$0xff] %vm20_vm1, %v178_v1  ;;  %v153_v3 = vld [vmem:[%s233_s0] sm:$0xff]   ;;  %vm48_vm2 = vcmask 261120   ;;  %s180_s0 = smov [#allocation3]  }
   0x5   :  { %22 = vst.msk [vmem:[#allocation2 + $0x8] sm:$0xff] %vm20_vm1, %v178_v1  ;;  %v134_v12 = vld [vmem:[%s235_s2] ss:$0 sm:$0xff]  ;;  %s119_s19 = sshll.u32 %s180_s0, 4  ;;  %s120_s19 = int_to_ptr.vmem [resolvable:$true] %s119_s19 }
   0x6   :  { %141 = vmatpush3.bf16.msra.mxu0 %v152_v2  ;;  %s154_s20 = scalar_lea.vmem %s120_s19, 256  ;;  %p159_p1 = scmp.lt.s32.totalorder %s120_s19, %s120_s19 }
   0x7   :  { %p155_p0 = scmp.ne.s32.totalorder %s120_s19, %s154_s20  ;;  %p160_p2 = scmp.lt.s32.totalorder %s154_s20, %s154_s20 }
   0x9   :  { %143 = vmatmul.mubr.msk.bf16.vlgmr.msra.gmra.mrb[0].mxu0 %vm48_vm2, %v153_v3  ;;  %p161_p3 = por %p160_p2, %p159_p1 }
   0xb   :  { %v23_v4 = vld [vmem:[#allocation2] sm:$0xff]  ;;  %p162_p4 = pnand %p161_p3, %p155_p0 }
   0xc   :  { %v24_v6 = vld [vmem:[#allocation2 + $0x8] sm:$0xff] }
  0xdc   :  { %v86_v5 = vpop.f32.mrb[0].mxu0 }
  0xdd   :  { %v93_v7 = vadd.f32 %v86_v5, %v23_v4  ;;  %v144_v8 = vpop.f32.mrb[1].mxu0 }
  0xde   :  { %v89_v9 = vpop.f32.mrb[2].mxu0 }
  0xdf   :  { %96 = vst.msk [vmem:[#allocation2] sm:$0xff] %vm20_vm1, %v93_v7  ;;  %v94_v10 = vadd.f32 %v89_v9, %v24_v6  ;;  %v145_v11 = vpop.f32.mrb[3].mxu0 }
  0xe1   :  { %97 = vst.msk [vmem:[#allocation2 + $0x8] sm:$0xff] %vm20_vm1, %v94_v10 }
  0xe6   :  { %v101_v13 = vld [vmem:[#allocation2] sm:$0xff] }
  0xe7   :  { %v110_v14 = vadd.f32 %v134_v12, %v101_v13 }
  0xe8   :  { %v102_v15 = vld [vmem:[#allocation2 + $0x8] sm:$0xff] }
  0xe9   :  { %v111_v16 = vadd.f32 %v134_v12, %v102_v15  ;;  %112 = vst.msk [vmem:[#allocation3] sm:$0xff] %vm20_vm1, %v110_v14 }
  0xeb   :  { %113 = vst.msk [vmem:[#allocation3 + $0x8] sm:$0xff] %vm20_vm1, %v111_v16 }
  0xec   :  { %165 = shalt.err (!%p162_p4)
}
  0xed   :  { %s166_s22 = scalar_lea.hbm %s236_s3, 256 }
  0xee   :  { %p167_p5 = scmp.ne.s32.totalorder %s236_s3, %s166_s22  ;;  %p170_p6 = scmp.lt.u32.totalorder %s166_s22, %s236_s3 }
  0xf0   :  { %p172_p7 = pnand %p170_p6, %p167_p5 }
  0xf2   :  { %175 = shalt.err (!%p172_p7)
}
  0xf3   :  { %s181_s27 = smov 128   ;;  %s182_s28 = smov 8  }
  0xf4   :  { %125 = dma.vmem_to_hbm [thread:$0]  %s120_s19, 256, %s236_s3, [#allocation4], %s181_s27, %s181_s27, %s182_s28  }
  0xf5   :  { %176 = dma.done.wait [#allocation4], 256  }
  0xf6   :  { %177 = vsyncadd [#allocation4], 4294967040 }
  0xf7   :  { %129 = vsyncpa [#allocation4], 1 }

// kernel: decoder_forward.22
= control target key start
LH: loop header
LB: loop body
LE: loop exit
PB: predicated region body
PF: predicated region fallthrough
CT: control target
= control target key end

     0   :  { %s638_s12 = smov 0   ;;  %s640_s13 = smov 0   ;;  %s694_s0 = inlined_call_operand.vmem [shape: bf16[8,8,8], index: 0, kind: input, shape index: {}]   ;;  %s695_s1 = inlined_call_operand.vmem [shape: bf16[8,8,8], index: 1, kind: input, shape index: {}]   ;;  %s696_s2 = inlined_call_operand.vmem [shape: bf16[8,8,8], index: 2, kind: input, shape index: {}]   ;;  %s697_s3 = inlined_call_operand.vmem [shape: bf16[8,8,8], index: 3, kind: output, shape index: {}]  }
   0x1   :  { %s642_s14 = smov 0  }
   0x2 LB: > { %s32_s15 = sadd.s32 1, %s608_s13  ;;  %p529_p0 = scmp.ge.s32.totalorder %s612_s14, 1  ;;  %s612_s14 = sphi %s642_s14, %s13_s14   ;;  %s608_s13 = sphi %s640_s13, %s699_s13   ;;  %s604_s12 = sphi %s638_s12, %s698_s12  }
   0x3   : > { %p34_p1 = scmp.ge.s32.totalorder %s32_s15, 8  ;;  %p190_p2 = scmp.lt.s32.totalorder %s612_s14, 9 }
   0x5   : > { %s701_s15 = smov (%p34_p1, %s32_s15), 0  ;;  %p191_p3 = pnand %p529_p0, %p190_p2 }
   0x6   : > { %p232_p4 = scmp.lt.s32.totalorder (!%p191_p3), %s604_s12, 7  ;;  %vm268_vm0 = vcmask (!%p191_p3), 64512   ;;  %v614_v0 = vmov (!%p191_p3), 0.0   ;;  %vm615_vm1 = vmmov (!%p191_p3), 0   ;;  %vm265_vm2 = vcmask (!%p191_p3), 7168  }
   0x7   : > { %194 = sbr.rel (%p191_p3) target bundleno = 825 (0x339), region = 32  ;;  %542 = vmatprep.subr.bf16.mxu0 (!%p191_p3), %v614_v0  ;;  %269 = vst.msk [vmem:[#allocation4] sm:$0xff] (!%p191_p3), %vm268_vm0, %v614_v0  ;;  %544 = vmatprep.mubr.msk.bf16.mxu0 (!%p191_p3), %vm615_vm1, %v614_v0  ;;  %v616_v4 = vmov (!%p191_p3), -inf   ;;  %v617_v11 = vmov (!%p191_p3), 0   ;;  %vm356_vm3 = vcmask (!%p191_p3), 1043456   ;;  %vm416_vm4 = vcmask (!%p191_p3), 60416  }
   0x8   : > { %548 = vmatprep.subr.bf16.mxu1 (!%p191_p3), %v614_v0  ;;  %550 = vmatprep.mubr.msk.bf16.mxu1 (!%p191_p3), %vm615_vm1, %v614_v0  ;;  %266 = vst.msk [vmem:[#allocation2] sm:$0xff] (!%p191_p3), %vm265_vm2, %v616_v4  ;;  %267 = vst.msk [vmem:[#allocation3] sm:$0xff] (!%p191_p3), %vm265_vm2, %v614_v0 }
   0x9   : > { %582 = vset.pattern.permute.xlu0 (!%p191_p3), %v617_v11  ;;  %583 = vset.pattern.permute.xlu1 (!%p191_p3), %v617_v11 }
   0xe   : > { %s703_s12 = smov (!%p232_p4, %s604_s12), 7  ;;  %v345_v32 = vld [vmem:[#allocation4] sm:$0xff] }
   0xf   : > { %s657_s16 = sshll.u32 %s703_s12, 2  ;;  %v321_v12 = vld [vmem:[#allocation2] sm:$0xff]  ;;  %v337_v26 = vld [vmem:[#allocation3] sm:$0xff] }
  0x10   : > { %s245_s19 = scalar_lea.vmem %s695_s1, %s657_s16  ;;  %s238_s22 = scalar_lea.vmem %s694_s0, %s657_s16 }
  0x11   : > { %v271_v1 = vld [vmem:[%s245_s19] sm:$0xf]  ;;  %s252_s25 = scalar_lea.vmem %s696_s2, %s657_s16  ;;  %s259_s28 = scalar_lea.vmem %s697_s3, %s657_s16 }
  0x12   : > { %v278_v2 = vsel %vm268_vm0, %v271_v1, 0  ;;  %v270_v3 = vld [vmem:[%s238_s22] sm:$0xf] }
  0x13   : > { %543 = vmatpush3.bf16.xpose.msra.mxu0 %v278_v2  ;;  %v272_v16 = vld [vmem:[%s252_s25] sm:$0xf] }
  0x14   : > { %v358_v17 = vsel %vm356_vm3, %v272_v16, 0 }
  0x15   : > { %549 = vmatpush3.bf16.msra.mxu1 %v358_v17 }
  0x1a   : > { %545 = vmatmul.mubr.msk.bf16.vlgmr.msra.gmra.mrb[0].mxu0 %vm268_vm0, %v270_v3 }
  0xed   : > { %v314_v5 = vpop.f32.mrb[0].mxu0 }
  0xee   : > { %v320_v6 = vmul.f32 0.17677669, %v314_v5  ;;  %v546_v7 = vpop.f32.mrb[1].mxu0 }
  0xef   : > { %v317_v8 = vpop.f32.mrb[2].mxu0 }
  0xf0   : > { %v547_v9 = vpop.f32.mrb[3].mxu0  ;;  %v322_v10 = vsel %vm268_vm0, %v320_v6, -inf }
  0xf1   : > { %323 = vmax.xlane.f32.xlu0 %v322_v10 }
 0x17e   : > { %v324_v13 = vpop.xlane.xlu0 %323 }
 0x17f   : > { %v325_v14 = vmax.f32 %v321_v12, %v324_v13 }
 0x181   : > { %v326_v15 = vsub.f32 %v321_v12, %v325_v14  ;;  %402 = vst.msk [vmem:[#allocation2] sm:$0xff] %vm265_vm2, %v325_v14  ;;  %331 = vperm.xlu0 %582, %v325_v14  }
 0x183   : > { %v327_v24 = vmul.f32 1.442695, %v326_v15 }
 0x200   : > { %v332_v18 = vpop.permute.xlu0 %331 }
 0x201   : > { %v334_v19 = vsub.f32 %v320_v6, %v332_v18 }
 0x203   : > { %v335_v20 = vmul.f32 1.442695, %v334_v19 }
 0x205   : > { %584 = vpow2.f32 %v335_v20 }
 0x206   : > { %586 = vpow2.f32 %v327_v24 }
 0x20f   : > { %v585_v21 = vpop.eup %584 }
 0x210   : > { %v339_v22 = vsel %vm268_vm0, %v585_v21, 0.0  ;;  %v352_v23 = vpack.c.bf16 %v585_v21, %v585_v21  ;;  %v587_v25 = vpop.eup %586 }
 0x211   : > { %340 = vadd.xlane.f32.xlu1 %v339_v22  ;;  %v338_v27 = vmul.f32 %v587_v25, %v337_v26 }
 0x212   : > { %551 = vmatmul.mubr.msk.bf16.vlgmr.msra.gmra.mrb[0].mxu1 %vm268_vm0, %v352_v23 }
 0x222   : > { %348 = vperm.xlu1 %583, %v587_v25  }
 0x29e   : > { %v341_v28 = vpop.xlane.xlu1 %340 }
 0x29f   : > { %v342_v29 = vadd.f32 %v341_v28, %v338_v27 }
 0x2a1   : > { %344 = vst.msk [vmem:[#allocation3] sm:$0xff] %vm265_vm2, %v342_v29 }
 0x2a2   : > { %v349_v33 = vpop.permute.xlu1 %348 }
 0x2a3   : > { %v351_v34 = vmul.f32 %v349_v33, %v345_v32 }
 0x2a8   : > { %v407_v30 = vld [vmem:[#allocation3] sm:$0xff] }
 0x2a9   : > { %588 = vrcp.f32 %v407_v30 }
 0x2b3   : > { %v589_v31 = vpop.eup %588 }
 0x2b4   : > { %411 = vperm.xlu1 %583, %v589_v31  }
 0x2e5   : > { %v394_v35 = vpop.f32.mrb[0].mxu1 }
 0x2e6   : > { %v400_v36 = vadd.f32 %v394_v35, %v351_v34  ;;  %v552_v37 = vpop.f32.mrb[1].mxu1 }
 0x2e7   : > { %v397_v38 = vpop.f32.mrb[2].mxu1 }
 0x2e8   : > { %401 = vst.msk [vmem:[#allocation4] sm:$0xff] %vm268_vm0, %v400_v36  ;;  %v553_v39 = vpop.f32.mrb[3].mxu1 }
 0x2ef   : > { %v406_v40 = vld [vmem:[#allocation4] sm:$0xff] }
 0x333   : > { %v412_v41 = vpop.permute.xlu1 %411 }
 0x334   : > { %v414_v42 = vmul.f32 %v412_v41, %v406_v40 }
 0x336   : > { %v415_v43 = vpack.c.bf16 %v414_v42, %v414_v42 }
 0x338   : > { %417 = vst.msk [vmem:[%s259_s28] sm:$0xf] %vm416_vm4, %v415_v43 }
 0x339 PF: > { %s13_s14 = sadd.s32 1, %s612_s14   ;;  %s698_s12 = smov %s608_s13 }
 0x33a   : > { %p10_p5 = scmp.ge.s32.totalorder %s13_s14, 10   ;;  %s699_s13 = smov %s701_s15 }
 0x33c   :  { %12 = sbr.rel (!%p10_p5) target bundleno = 2 (0x2), region = 76 }

// kernel: decoder_forward.24
= control target key start
LH: loop header
LB: loop body
LE: loop exit
PB: predicated region body
PF: predicated region fallthrough
CT: control target
= control target key end

     0   :  { %v290_v0 = vmov 0.0   ;;  %vm291_vm0 = vmmov 0   ;;  %vm53_vm1 = vcmask 261120   ;;  %vm140_vm2 = vcmask 523264   ;;  %s381_s1 = inlined_call_operand.vmem [shape: bf16[32,64], index: 1, kind: input, shape index: {}]   ;;  %s382_s0 = inlined_call_operand.vmem [shape: f32[16,32], index: 0, kind: input, shape index: {}]   ;;  %s383_s3 = inlined_call_operand.vmem [shape: bf16[64,32], index: 3, kind: input, shape index: {}]   ;;  %s384_s2 = inlined_call_operand.vmem [shape: f32[1,64], index: 2, kind: input, shape index: {}]   ;;  %s385_s4 = inlined_call_operand.vmem [shape: f32[1,32], index: 4, kind: input, shape index: {}]   ;;  %s386_s5 = inlined_call_operand.vmem [shape: f32[1,32], index: 5, kind: input, shape index: {}]   ;;  %s387_s6 = inlined_call_operand.vmem [shape: f32[1,32], index: 6, kind: input, shape index: {}]   ;;  %s388_s7 = inlined_call_operand.vmem [shape: f32[16,32], index: 7, kind: output, shape index: {}]  }
   0x1   :  { %258 = vmatprep.subr.bf16.mxu0 %v290_v0  ;;  %v280_v1 = vld [vmem:[%s381_s1] sm:$0xff]   ;;  %262 = vmatprep.mubr.msk.bf16.mxu0 %vm291_vm0, %v290_v0  ;;  %v281_v2 = vld [vmem:[%s381_s1 + $0x8] sm:$0xff]   ;;  %v284_v8 = vld [vmem:[%s383_s3 + $0x10] sm:$0xff]  }
   0x2   :  { %266 = vmatprep.subr.bf16.mxu1 %v290_v0  ;;  %274 = vmatprep.mubr.msk.bf16.mxu1 %vm291_vm0, %v290_v0  ;;  %v27_v3 = vld [vmem:[%s382_s0] sm:$0xff]  ;;  %v28_v4 = vld [vmem:[%s382_s0 + $0x8] sm:$0xff]  ;;  %v285_v9 = vld [vmem:[%s383_s3 + $0x18] sm:$0xff]  }
   0x3   :  { %259 = vmatpush3.bf16.msra.mxu0 %v280_v1  ;;  %v282_v5 = vld [vmem:[%s383_s3] sm:$0xff]   ;;  %v283_v6 = vld [vmem:[%s383_s3 + $0x8] sm:$0xff]   ;;  %v29_v7 = vpack.c.bf16 %v28_v4, %v27_v3 }
   0x4   :  { %260 = vmatprep.subr.bf16.mxu0 %v290_v0  ;;  %267 = vmatpush3.bf16.msra.mxu1 %v282_v5  ;;  %v238_v10 = vld [vmem:[%s384_s2] ss:$0 sm:$0xff] }
   0x5   :  { %268 = vmatprep.subr.bf16.mxu1 %v290_v0  ;;  %v242_v20 = vld [vmem:[%s385_s4] ss:$0 sm:$0xff] }
   0x6   :  { %v248_v48 = vld [vmem:[%s386_s5] ss:$0 sm:$0xff] }
   0x7   :  { %261 = vmatpush3.bf16.msra.mxu0 %v281_v2  ;;  %v249_v50 = vld [vmem:[%s387_s6] ss:$0 sm:$0xff] }
   0x8   :  { %269 = vmatpush3.bf16.msra.mxu1 %v283_v6 }
   0x9   :  { %270 = vmatprep.subr.bf16.mxu1 %v290_v0 }
   0xa   :  { %263 = vmatmul.mubr.msk.bf16.vlgmr.msra.gmra.mrb[0].mxu0 %vm53_vm1, %v29_v7 }
   0xc   :  { %271 = vmatpush3.bf16.msra.mxu1 %v284_v8 }
   0xd   :  { %272 = vmatprep.subr.bf16.mxu1 %v290_v0 }
  0x10   :  { %273 = vmatpush3.bf16.msra.mxu1 %v285_v9 }
  0xdd   :  { %v91_v11 = vpop.f32.mrb[0].mxu0 }
  0xde   :  { %v92_v12 = vadd.f32 %v238_v10, %v91_v11  ;;  %v264_v13 = vpop.f32.mrb[1].mxu0 }
  0xdf   :  { %v94_v14 = vpop.f32.mrb[2].mxu0 }
  0xe0   :  { %v95_v15 = vadd.f32 %v238_v10, %v94_v14  ;;  %v265_v16 = vpop.f32.mrb[3].mxu0  ;;  %v98_v17 = vmax.f32 %v92_v12, 0.0 }
  0xe2   :  { %v99_v18 = vmax.f32 %v95_v15, 0.0 }
  0xe4   :  { %v100_v19 = vpack.c.bf16 %v99_v18, %v98_v17 }
  0xe6   :  { %275 = vmatmul.mubr.msk.bf16.vlgmr.msra.gmra.mrb[0].mxu1 %vm140_vm2, %v100_v19 }
 0x1b9   :  { %v178_v21 = vpop.f32.mrb[0].mxu1 }
 0x1ba   :  { %v179_v22 = vadd.f32 %v242_v20, %v178_v21  ;;  %v276_v23 = vpop.f32.mrb[1].mxu1 }
 0x1bb   :  { %v181_v24 = vpop.f32.mrb[2].mxu1 }
 0x1bc   :  { %v182_v25 = vadd.f32 %v242_v20, %v181_v24  ;;  %v277_v26 = vpop.f32.mrb[3].mxu1  ;;  %v185_v27 = vadd.f32 %v179_v22, %v27_v3 }
 0x1be   :  { %v187_v28 = vsel %vm53_vm1, %v185_v27, 0.0  ;;  %v186_v29 = vadd.f32 %v182_v25, %v28_v4 }
 0x1bf   :  { %188 = vadd.xlane.f32.xlu0 %v187_v28 }
 0x1c0   :  { %v190_v30 = vsel %vm53_vm1, %v186_v29, 0.0 }
 0x1c3   :  { %191 = vadd.xlane.f32.xlu0 %v190_v30 }
 0x24c   :  { %v189_v31 = vpop.xlane.xlu0 %188 }
 0x24d   :  { %v194_v32 = vmul.f32 0.03125, %v189_v31 }
 0x24f   :  { %v196_v33 = vsub.f32 %v185_v27, %v194_v32 }
 0x250   :  { %v192_v34 = vpop.xlane.xlu0 %191 }
 0x251   :  { %v195_v35 = vmul.f32 0.03125, %v192_v34  ;;  %v198_v36 = vmul.f32 %v196_v33, %v196_v33 }
 0x253   :  { %v197_v37 = vsub.f32 %v186_v29, %v195_v35  ;;  %v200_v38 = vsel %vm53_vm1, %v198_v36, 0.0 }
 0x254   :  { %201 = vadd.xlane.f32.xlu1 %v200_v38 }
 0x255   :  { %v199_v39 = vmul.f32 %v197_v37, %v197_v37 }
 0x257   :  { %v203_v40 = vsel %vm53_vm1, %v199_v39, 0.0 }
 0x258   :  { %204 = vadd.xlane.f32.xlu1 %v203_v40 }
 0x2e1   :  { %v202_v41 = vpop.xlane.xlu1 %201 }
 0x2e2   :  { %v206_v42 = vmul.f32 0.03125, %v202_v41 }
 0x2e4   :  { %v208_v43 = vadd.f32 1e-05, %v206_v42 }
 0x2e5   :  { %v205_v44 = vpop.xlane.xlu1 %204 }
 0x2e6   :  { %286 = vrsqrt.f32 %v208_v43  ;;  %v207_v45 = vmul.f32 0.03125, %v205_v44 }
 0x2e8   :  { %v209_v46 = vadd.f32 1e-05, %v207_v45 }
 0x2ea   :  { %288 = vrsqrt.f32 %v209_v46 }
 0x2f0   :  { %v287_v47 = vpop.eup %286 }
 0x2f1   :  { %v212_v49 = vmul.f32 %v287_v47, %v196_v33 }
 0x2f3   :  { %v221_v51 = vmul.f32 %v248_v48, %v212_v49 }
 0x2f4   :  { %v289_v52 = vpop.eup %288 }
 0x2f5   :  { %v230_v53 = vadd.f32 %v249_v50, %v221_v51  ;;  %v213_v54 = vmul.f32 %v289_v52, %v197_v37 }
 0x2f7   :  { %232 = vst.msk [vmem:[%s388_s7] sm:$0xff] %vm53_vm1, %v230_v53  ;;  %v222_v55 = vmul.f32 %v248_v48, %v213_v54 }
 0x2f9   :  { %v231_v56 = vadd.f32 %v249_v50, %v222_v55 }
 0x2fb   :  { %233 = vst.msk [vmem:[%s388_s7 + $0x8] sm:$0xff] %vm53_vm1, %v231_v56 }

</bundles_post_ra>
